<compile_context>
chip_gen: v6e
topology: v6e:2x2x1
jax: 0.10.0
libtpu: 0.0.40
codegen_flags: <defaults>
</compile_context>

<pallas_src>
import jax
import jax.numpy as jnp
from jax import lax
from jax.experimental import pallas as pl
from jax.experimental.pallas import tpu as pltpu

LN_EPS = 1e-5  # PyTorch nn.LayerNorm default


def _layernorm(v, g, b):
    mu = jnp.mean(v, axis=-1, keepdims=True)
    var = jnp.mean((v - mu) ** 2, axis=-1, keepdims=True)  # biased, like torch
    return (v - mu) * lax.rsqrt(var + LN_EPS) * g + b


# ----------------------------------------------------------------------------
# Kernel 1: fc -> AFT-Full attention -> relu/layernorm gating -> LSTM input
#           projection.  One grid step handles bb batch rows; all row-wise
#           matmuls are done on the flattened (bb*T, .) slab.
# ----------------------------------------------------------------------------
def prep_kernel(x_ref, wfc_ref, bfc_ref,
                wqkv_ref, bqkv_ref, ew_ref,
                wp_ref, bp_ref,
                g1_ref, be1_ref, g2_ref, be2_ref,
                wg_ref, bg_ref,
                out_ref):
    bb, T, In = x_ref.shape
    H = wp_ref.shape[0]
    M = bb * T

    x = x_ref[...].reshape(M, In)                                         # (bb*T, In)
    xf = jnp.dot(x, wfc_ref[...], preferred_element_type=jnp.float32) + bfc_ref[...]

    # Fused q|k|v projection: one (M,H) @ (H,3H) matmul.
    qkv = jnp.dot(xf, wqkv_ref[...], preferred_element_type=jnp.float32) + bqkv_ref[...]
    q = qkv[:, 0 * H:1 * H]
    k = qkv[:, 1 * H:2 * H]
    v = qkv[:, 2 * H:3 * H]

    # AFT-Full.  Two batched dots (avoids an in-kernel lane concat when H < 128).
    ek = jnp.exp(k)                                                       # (M, H)
    ewb = jnp.broadcast_to(ew_ref[...], (bb, T, T))                       # batch-invariant
    num = jnp.einsum('bts,bsh->bth', ewb, (ek * v).reshape(bb, T, H),
                     preferred_element_type=jnp.float32)                  # (bb, T, H)
    den = jnp.einsum('bts,bsh->bth', ewb, ek.reshape(bb, T, H),
                     preferred_element_type=jnp.float32)                  # (bb, T, H)
    yt = jax.nn.sigmoid(q) * (num.reshape(M, H) / den.reshape(M, H))      # (M, H)

    a = jnp.dot(yt, wp_ref[...], preferred_element_type=jnp.float32) + bp_ref[...]
    filt = jnp.maximum(a, 0.0)                                            # relu(A)
    af_x = _layernorm(a, g1_ref[...], be1_ref[...])                       # norm1(A)
    prod = _layernorm(filt * af_x, g2_ref[...], be2_ref[...])             # norm2(...)

    # LSTM input projection for all rows/timesteps, fused gate weights (H, 4H).
    out = jnp.dot(prod, wg_ref[...], preferred_element_type=jnp.float32) + bg_ref[...]
    out_ref[...] = out.reshape(bb, T, 4 * H)                              # (bb, T, 4H)


# ----------------------------------------------------------------------------
# Kernel 2: custom LSTM recurrence over T for bb batch rows at once.
#           lax.fori_loop with (h, c) carries; one (bb,H)@(H,4H) matmul per step.
# ----------------------------------------------------------------------------
def lstm_kernel(xw_ref, u_ref, hseq_ref, ct_ref):
    bb, T, _ = xw_ref.shape
    H = u_ref.shape[0]
    u = u_ref[...]                                                        # (H, 4H)

    def step(t, carry):
        h, c = carry
        xw_t = xw_ref[:, pl.ds(t, 1), :][:, 0, :]                         # (bb, 4H)
        gates = xw_t + jnp.dot(h, u, preferred_element_type=jnp.float32)  # (bb, 4H)
        i_t = jax.nn.sigmoid(gates[:, 0 * H:1 * H])
        f_t = jax.nn.sigmoid(gates[:, 1 * H:2 * H])
        g_t = jnp.tanh(gates[:, 2 * H:3 * H])
        o_t = jax.nn.sigmoid(gates[:, 3 * H:4 * H])
        c_n = f_t * c + i_t * g_t
        h_n = o_t * jnp.tanh(c_n)
        hseq_ref[:, pl.ds(t, 1), :] = h_n[:, None, :]
        return (h_n, c_n)

    h0 = jnp.zeros((bb, H), jnp.float32)
    c0 = jnp.zeros((bb, H), jnp.float32)
    _, c_T = lax.fori_loop(0, T, step, (h0, c0), unroll=min(8, T))
    ct_ref[...] = c_T


# ----------------------------------------------------------------------------
# Wrapper
# ----------------------------------------------------------------------------
def _const_spec(shape):
    n = len(shape)
    return pl.BlockSpec(shape, lambda *_: (0,) * n)


def _pick_bb(B):
    # Batch rows per grid step: >= 8 when possible (fills MXU sublanes / makes
    # writebacks dense), exact divisor preferred to avoid padding waste.
    for cand in (64, 32, 16, 8):
        if B % cand == 0:
            return cand
    return 8 if B > 8 else B


@jax.jit
def af_lstm_forward(x, params):
    B, T, In = x.shape
    H = params["w_fc"].shape[1]
    assert T <= params["wbias"].shape[0], "T must be <= max_seqlen"

    bb = _pick_bb(B)
    Bp = ((B + bb - 1) // bb) * bb
    if Bp != B:
        x = jnp.pad(x, ((0, Bp - B), (0, 0), (0, 0)))
    nblk = Bp // bb

    # Batch-invariant precomputation (plain XLA, once per call):
    ew = jnp.exp(params["wbias"][:T, :T])                                 # (T, T)
    w_qkv = jnp.concatenate([params["w_q"], params["w_k"], params["w_v"]], axis=1)
    b_qkv = jnp.concatenate([params["b_q"], params["b_k"], params["b_v"]], axis=1)
    w_g = jnp.concatenate([params["w_i"], params["w_f"], params["w_c"], params["w_o"]], axis=1)
    b_g = jnp.concatenate([params["b_i"], params["b_f"], params["b_c"], params["b_o"]], axis=1)
    u_g = jnp.concatenate([params["u_i"], params["u_f"], params["u_c"], params["u_o"]], axis=1)

    cparams = pltpu.CompilerParams(dimension_semantics=("parallel",),
                                   vmem_limit_bytes=64 << 20)

    # ---- prep kernel: (Bp, T, In) -> gate pre-activations xw (Bp, T, 4H) ----
    prep_args = (x,
                 params["w_fc"], params["b_fc"],
                 w_qkv, b_qkv, ew,
                 params["w_p"], params["b_p"],
                 params["g1"], params["be1"],
                 params["g2"], params["be2"],
                 w_g, b_g)
    prep_in_specs = [pl.BlockSpec((bb, T, In), lambda b: (b, 0, 0))]
    prep_in_specs += [_const_spec(a.shape) for a in prep_args[1:]]

    xw = pl.pallas_call(
        prep_kernel,
        out_shape=jax.ShapeDtypeStruct((Bp, T, 4 * H), jnp.float32),
        grid=(nblk,),
        in_specs=prep_in_specs,
        out_specs=pl.BlockSpec((bb, T, 4 * H), lambda b: (b, 0, 0)),
        compiler_params=cparams,
    )(*prep_args)

    # ---- LSTM kernel: bb batch rows per grid step ----
    hseq, ct = pl.pallas_call(
        lstm_kernel,
        out_shape=(jax.ShapeDtypeStruct((Bp, T, H), jnp.float32),
                   jax.ShapeDtypeStruct((Bp, H), jnp.float32)),
        grid=(nblk,),
        in_specs=[pl.BlockSpec((bb, T, 4 * H), lambda b: (b, 0, 0)),
                  _const_spec((H, 4 * H))],
        out_specs=(pl.BlockSpec((bb, T, H), lambda b: (b, 0, 0)),
                   pl.BlockSpec((bb, H), lambda b: (b, 0))),
        compiler_params=cparams,
    )(xw, u_g)

    hseq = hseq[:B]
    ct = ct[:B]
    ht = hseq[:, T - 1, :]       # h_T == last hidden state; no separate pallas output.
    return hseq, (ht, ct)


# ----------------------------------------------------------------------------
# Pure-JAX reference (unfused weights, for verification)
# ----------------------------------------------------------------------------
def ref_forward(x, p):
    def ln(v, g, b):
        mu = jnp.mean(v, axis=-1, keepdims=True)
        var = jnp.mean((v - mu) ** 2, axis=-1, keepdims=True)
        return (v - mu) / jnp.sqrt(var + LN_EPS) * g + b

    B, T, _ = x.shape
    H = p["w_fc"].shape[1]
    xf = x @ p["w_fc"] + p["b_fc"]
    q = xf @ p["w_q"] + p["b_q"]
    k = xf @ p["w_k"] + p["b_k"]
    v = xf @ p["w_v"] + p["b_v"]
    ew = jnp.exp(p["wbias"][:T, :T])
    num = jnp.einsum("ts,bsh->bth", ew, jnp.exp(k) * v)
    den = jnp.einsum("ts,bsh->bth", ew, jnp.exp(k))
    a = (jax.nn.sigmoid(q) * (num / den)) @ p["w_p"] + p["b_p"]
    filt = jnp.maximum(a, 0.0)
    prod = ln(filt * ln(a, p["g1"], p["be1"]), p["g2"], p["be2"])

    h = jnp.zeros((B, H), jnp.float32)
    c = jnp.zeros((B, H), jnp.float32)
    hs = []
    for t in range(T):
        x_t = prod[:, t, :]
        i_t = jax.nn.sigmoid(x_t @ p["w_i"] + h @ p["u_i"] + p["b_i"])
        f_t = jax.nn.sigmoid(x_t @ p["w_f"] + h @ p["u_f"] + p["b_f"])
        g_t = jnp.tanh(x_t @ p["w_c"] + h @ p["u_c"] + p["b_c"])
        o_t = jax.nn.sigmoid(x_t @ p["w_o"] + h @ p["u_o"] + p["b_o"])
        c = f_t * c + i_t * g_t
        h = o_t * jnp.tanh(c)
        hs.append(h)
    return jnp.stack(hs, axis=1), (h, c)


# ----------------------------------------------------------------------------
# Deterministic parameter init (AF_LSTM.init -> uniform(-1/sqrt(H), 1/sqrt(H)))
# ----------------------------------------------------------------------------
def init_params(key, input_size, hidden_size, max_seqlen):
    std = 1.0 / jnp.sqrt(jnp.float32(hidden_size))
    names_shapes = {
        "w_fc": (input_size, hidden_size), "b_fc": (1, hidden_size),
        "w_q": (hidden_size, hidden_size), "b_q": (1, hidden_size),
        "w_k": (hidden_size, hidden_size), "b_k": (1, hidden_size),
        "w_v": (hidden_size, hidden_size), "b_v": (1, hidden_size),
        "w_p": (hidden_size, hidden_size), "b_p": (1, hidden_size),
        "wbias": (max_seqlen, max_seqlen),
        "g1": (1, hidden_size), "be1": (1, hidden_size),
        "g2": (1, hidden_size), "be2": (1, hidden_size),
        "w_i": (hidden_size, hidden_size), "u_i": (hidden_size, hidden_size), "b_i": (1, hidden_size),
        "w_f": (hidden_size, hidden_size), "u_f": (hidden_size, hidden_size), "b_f": (1, hidden_size),
        "w_c": (hidden_size, hidden_size), "u_c": (hidden_size, hidden_size), "b_c": (1, hidden_size),
        "w_o": (hidden_size, hidden_size), "u_o": (hidden_size, hidden_size), "b_o": (1, hidden_size),
    }
    keys = jax.random.split(key, len(names_shapes))
    params = {}
    for k_, (name, shp) in zip(keys, names_shapes.items()):
        params[name] = jax.random.uniform(k_, shp, jnp.float32, -std, std)
    return params


if __name__ == "__main__":
    B, T, In, H, MAXT = 2, 8, 4, 32, 8
    key = jax.random.PRNGKey(0)
    k_x, k_p = jax.random.split(key)
    x = jax.random.normal(k_x, (B, T, In), jnp.float32)
    params = init_params(k_p, In, H, MAXT)

    hidden_seq, (h_t, c_t) = af_lstm_forward(x, params)
    jax.block_until_ready((hidden_seq, h_t, c_t))

    hs_ref, (h_ref, c_ref) = ref_forward(x, params)
    assert hidden_seq.shape == (B, T, H) and h_t.shape == (B, H) and c_t.shape == (B, H)
    assert jnp.allclose(hidden_seq, hs_ref, atol=1e-4, rtol=1e-4)
    assert jnp.allclose(h_t, h_ref, atol=1e-4, rtol=1e-4)
    assert jnp.allclose(c_t, c_ref, atol=1e-4, rtol=1e-4)

    print("KERNEL_OK")
</pallas_src>

<mosaic_0001>
module attributes {stable_mosaic.version = 11 : i64} {
  func.func @lstm_kernel(%arg0: i32, %arg1: memref<2x8x128xf32, #tpu.memory_space<vmem>>, %arg2: memref<32x128xf32, #tpu.memory_space<vmem>>, %arg3: memref<2x8x32xf32, #tpu.memory_space<vmem>>, %arg4: memref<2x32xf32, #tpu.memory_space<vmem>>) attributes {dimension_semantics = [#tpu.dimension_semantics<parallel>], iteration_bounds = array<i64: 1>, scalar_prefetch = 0 : i64, scratch_operands = 0 : i64, tpu.core_type = #tpu.core_type<tc>, window_params = [{transform_indices = @transform_0, window_bounds = array<i64: 2, 8, 128>}, {pipeline_mode = #tpu.pipeline_mode<synchronous>, transform_indices = @transform_1, window_bounds = array<i64: 32, 128>}, {transform_indices = @transform_2, window_bounds = array<i64: 2, 8, 32>}, {transform_indices = @transform_3, window_bounds = array<i64: 2, 32>}]} {
    %c0 = arith.constant 0 : index
    %c0_0 = arith.constant 0 : index
    %0 = vector.load %arg2[%c0, %c0_0] : memref<32x128xf32, #tpu.memory_space<vmem>>, vector<32x128xf32>
    %cst = arith.constant 0.000000e+00 : f32
    %1 = vector.broadcast %cst : f32 to vector<2x32xf32>
    %cst_1 = arith.constant 0.000000e+00 : f32
    %2 = vector.broadcast %cst_1 : f32 to vector<2x32xf32>
    %c0_i32 = arith.constant 0 : i32
    %c0_2 = arith.constant 0 : index
    %3 = arith.index_cast %c0_i32 : i32 to index
    %c0_3 = arith.constant 0 : index
    %4 = vector.load %arg1[%c0_2, %3, %c0_3] : memref<2x8x128xf32, #tpu.memory_space<vmem>>, vector<2x1x128xf32>
    %5 = vector.shape_cast %4 : vector<2x1x128xf32> to vector<2x128xf32>
    %cst_4 = arith.constant dense<0.000000e+00> : vector<2x128xf32>
    %6 = tpu.matmul %1, %0, %cst_4 {dimension_numbers = #tpu.dot_dimension_numbers<[1], [0], [0], [1], [0, 0, 1, 1], [], []>} : vector<2x32xf32>, vector<32x128xf32>, vector<2x128xf32> -> vector<2x128xf32>
    %7 = arith.addf %5, %6 : vector<2x128xf32>
    %8 = vector.extract_strided_slice %7 {offsets = [0, 0], sizes = [2, 32], strides = [1, 1]} : vector<2x128xf32> to vector<2x32xf32>
    %9 = arith.negf %8 : vector<2x32xf32>
    %10 = math.exp %9 : vector<2x32xf32>
    %cst_5 = arith.constant 1.000000e+00 : f32
    %11 = vector.broadcast %cst_5 : f32 to vector<2x32xf32>
    %12 = arith.addf %11, %10 : vector<2x32xf32>
    %13 = arith.divf %11, %12 : vector<2x32xf32>
    %14 = vector.extract_strided_slice %7 {offsets = [0, 32], sizes = [2, 32], strides = [1, 1]} : vector<2x128xf32> to vector<2x32xf32>
    %15 = arith.negf %14 : vector<2x32xf32>
    %16 = math.exp %15 : vector<2x32xf32>
    %cst_6 = arith.constant 1.000000e+00 : f32
    %17 = vector.broadcast %cst_6 : f32 to vector<2x32xf32>
    %18 = arith.addf %17, %16 : vector<2x32xf32>
    %19 = arith.divf %17, %18 : vector<2x32xf32>
    %20 = vector.extract_strided_slice %7 {offsets = [0, 64], sizes = [2, 32], strides = [1, 1]} : vector<2x128xf32> to vector<2x32xf32>
    %21 = math.tanh %20 : vector<2x32xf32>
    %22 = vector.extract_strided_slice %7 {offsets = [0, 96], sizes = [2, 32], strides = [1, 1]} : vector<2x128xf32> to vector<2x32xf32>
    %23 = arith.negf %22 : vector<2x32xf32>
    %24 = math.exp %23 : vector<2x32xf32>
    %cst_7 = arith.constant 1.000000e+00 : f32
    %25 = vector.broadcast %cst_7 : f32 to vector<2x32xf32>
    %26 = arith.addf %25, %24 : vector<2x32xf32>
    %27 = arith.divf %25, %26 : vector<2x32xf32>
    %28 = arith.mulf %19, %2 : vector<2x32xf32>
    %29 = arith.mulf %13, %21 : vector<2x32xf32>
    %30 = arith.addf %28, %29 : vector<2x32xf32>
    %31 = math.tanh %30 : vector<2x32xf32>
    %32 = arith.mulf %27, %31 : vector<2x32xf32>
    %33 = vector.shape_cast %32 : vector<2x32xf32> to vector<2x1x32xf32>
    %c0_8 = arith.constant 0 : index
    %34 = arith.index_cast %c0_i32 : i32 to index
    %c0_9 = arith.constant 0 : index
    %35 = vector.load %arg3[%c0_8, %34, %c0_9] : memref<2x8x32xf32, #tpu.memory_space<vmem>>, vector<2x1x32xf32>
    tpu.vector_store %arg3[%c0_8, %34, %c0_9], %33 {strides = array<i32>} : memref<2x8x32xf32, #tpu.memory_space<vmem>>, vector<2x1x32xf32>,
    %c1_i32 = arith.constant 1 : i32
    %c0_10 = arith.constant 0 : index
    %36 = arith.index_cast %c1_i32 : i32 to index
    %c0_11 = arith.constant 0 : index
    %37 = vector.load %arg1[%c0_10, %36, %c0_11] : memref<2x8x128xf32, #tpu.memory_space<vmem>>, vector<2x1x128xf32>
    %38 = vector.shape_cast %37 : vector<2x1x128xf32> to vector<2x128xf32>
    %cst_12 = arith.constant dense<0.000000e+00> : vector<2x128xf32>
    %39 = tpu.matmul %32, %0, %cst_12 {dimension_numbers = #tpu.dot_dimension_numbers<[1], [0], [0], [1], [0, 0, 1, 1], [], []>} : vector<2x32xf32>, vector<32x128xf32>, vector<2x128xf32> -> vector<2x128xf32>
    %40 = arith.addf %38, %39 : vector<2x128xf32>
    %41 = vector.extract_strided_slice %40 {offsets = [0, 0], sizes = [2, 32], strides = [1, 1]} : vector<2x128xf32> to vector<2x32xf32>
    %42 = arith.negf %41 : vector<2x32xf32>
    %43 = math.exp %42 : vector<2x32xf32>
    %cst_13 = arith.constant 1.000000e+00 : f32
    %44 = vector.broadcast %cst_13 : f32 to vector<2x32xf32>
    %45 = arith.addf %44, %43 : vector<2x32xf32>
    %46 = arith.divf %44, %45 : vector<2x32xf32>
    %47 = vector.extract_strided_slice %40 {offsets = [0, 32], sizes = [2, 32], strides = [1, 1]} : vector<2x128xf32> to vector<2x32xf32>
    %48 = arith.negf %47 : vector<2x32xf32>
    %49 = math.exp %48 : vector<2x32xf32>
    %cst_14 = arith.constant 1.000000e+00 : f32
    %50 = vector.broadcast %cst_14 : f32 to vector<2x32xf32>
    %51 = arith.addf %50, %49 : vector<2x32xf32>
    %52 = arith.divf %50, %51 : vector<2x32xf32>
    %53 = vector.extract_strided_slice %40 {offsets = [0, 64], sizes = [2, 32], strides = [1, 1]} : vector<2x128xf32> to vector<2x32xf32>
    %54 = math.tanh %53 : vector<2x32xf32>
    %55 = vector.extract_strided_slice %40 {offsets = [0, 96], sizes = [2, 32], strides = [1, 1]} : vector<2x128xf32> to vector<2x32xf32>
    %56 = arith.negf %55 : vector<2x32xf32>
    %57 = math.exp %56 : vector<2x32xf32>
    %cst_15 = arith.constant 1.000000e+00 : f32
    %58 = vector.broadcast %cst_15 : f32 to vector<2x32xf32>
    %59 = arith.addf %58, %57 : vector<2x32xf32>
    %60 = arith.divf %58, %59 : vector<2x32xf32>
    %61 = arith.mulf %52, %30 : vector<2x32xf32>
    %62 = arith.mulf %46, %54 : vector<2x32xf32>
    %63 = arith.addf %61, %62 : vector<2x32xf32>
    %64 = math.tanh %63 : vector<2x32xf32>
    %65 = arith.mulf %60, %64 : vector<2x32xf32>
    %66 = vector.shape_cast %65 : vector<2x32xf32> to vector<2x1x32xf32>
    %c0_16 = arith.constant 0 : index
    %67 = arith.index_cast %c1_i32 : i32 to index
    %c0_17 = arith.constant 0 : index
    %68 = vector.load %arg3[%c0_16, %67, %c0_17] : memref<2x8x32xf32, #tpu.memory_space<vmem>>, vector<2x1x32xf32>
    tpu.vector_store %arg3[%c0_16, %67, %c0_17], %66 {strides = array<i32>} : memref<2x8x32xf32, #tpu.memory_space<vmem>>, vector<2x1x32xf32>,
    %c2_i32 = arith.constant 2 : i32
    %c0_18 = arith.constant 0 : index
    %69 = arith.index_cast %c2_i32 : i32 to index
    %c0_19 = arith.constant 0 : index
    %70 = vector.load %arg1[%c0_18, %69, %c0_19] : memref<2x8x128xf32, #tpu.memory_space<vmem>>, vector<2x1x128xf32>
    %71 = vector.shape_cast %70 : vector<2x1x128xf32> to vector<2x128xf32>
    %cst_20 = arith.constant dense<0.000000e+00> : vector<2x128xf32>
    %72 = tpu.matmul %65, %0, %cst_20 {dimension_numbers = #tpu.dot_dimension_numbers<[1], [0], [0], [1], [0, 0, 1, 1], [], []>} : vector<2x32xf32>, vector<32x128xf32>, vector<2x128xf32> -> vector<2x128xf32>
    %73 = arith.addf %71, %72 : vector<2x128xf32>
    %74 = vector.extract_strided_slice %73 {offsets = [0, 0], sizes = [2, 32], strides = [1, 1]} : vector<2x128xf32> to vector<2x32xf32>
    %75 = arith.negf %74 : vector<2x32xf32>
    %76 = math.exp %75 : vector<2x32xf32>
    %cst_21 = arith.constant 1.000000e+00 : f32
    %77 = vector.broadcast %cst_21 : f32 to vector<2x32xf32>
    %78 = arith.addf %77, %76 : vector<2x32xf32>
    %79 = arith.divf %77, %78 : vector<2x32xf32>
    %80 = vector.extract_strided_slice %73 {offsets = [0, 32], sizes = [2, 32], strides = [1, 1]} : vector<2x128xf32> to vector<2x32xf32>
    %81 = arith.negf %80 : vector<2x32xf32>
    %82 = math.exp %81 : vector<2x32xf32>
    %cst_22 = arith.constant 1.000000e+00 : f32
    %83 = vector.broadcast %cst_22 : f32 to vector<2x32xf32>
    %84 = arith.addf %83, %82 : vector<2x32xf32>
    %85 = arith.divf %83, %84 : vector<2x32xf32>
    %86 = vector.extract_strided_slice %73 {offsets = [0, 64], sizes = [2, 32], strides = [1, 1]} : vector<2x128xf32> to vector<2x32xf32>
    %87 = math.tanh %86 : vector<2x32xf32>
    %88 = vector.extract_strided_slice %73 {offsets = [0, 96], sizes = [2, 32], strides = [1, 1]} : vector<2x128xf32> to vector<2x32xf32>
    %89 = arith.negf %88 : vector<2x32xf32>
    %90 = math.exp %89 : vector<2x32xf32>
    %cst_23 = arith.constant 1.000000e+00 : f32
    %91 = vector.broadcast %cst_23 : f32 to vector<2x32xf32>
    %92 = arith.addf %91, %90 : vector<2x32xf32>
    %93 = arith.divf %91, %92 : vector<2x32xf32>
    %94 = arith.mulf %85, %63 : vector<2x32xf32>
    %95 = arith.mulf %79, %87 : vector<2x32xf32>
    %96 = arith.addf %94, %95 : vector<2x32xf32>
    %97 = math.tanh %96 : vector<2x32xf32>
    %98 = arith.mulf %93, %97 : vector<2x32xf32>
    %99 = vector.shape_cast %98 : vector<2x32xf32> to vector<2x1x32xf32>
    %c0_24 = arith.constant 0 : index
    %100 = arith.index_cast %c2_i32 : i32 to index
    %c0_25 = arith.constant 0 : index
    %101 = vector.load %arg3[%c0_24, %100, %c0_25] : memref<2x8x32xf32, #tpu.memory_space<vmem>>, vector<2x1x32xf32>
    tpu.vector_store %arg3[%c0_24, %100, %c0_25], %99 {strides = array<i32>} : memref<2x8x32xf32, #tpu.memory_space<vmem>>, vector<2x1x32xf32>,
    %c3_i32 = arith.constant 3 : i32
    %c0_26 = arith.constant 0 : index
    %102 = arith.index_cast %c3_i32 : i32 to index
    %c0_27 = arith.constant 0 : index
    %103 = vector.load %arg1[%c0_26, %102, %c0_27] : memref<2x8x128xf32, #tpu.memory_space<vmem>>, vector<2x1x128xf32>
    %104 = vector.shape_cast %103 : vector<2x1x128xf32> to vector<2x128xf32>
    %cst_28 = arith.constant dense<0.000000e+00> : vector<2x128xf32>
    %105 = tpu.matmul %98, %0, %cst_28 {dimension_numbers = #tpu.dot_dimension_numbers<[1], [0], [0], [1], [0, 0, 1, 1], [], []>} : vector<2x32xf32>, vector<32x128xf32>, vector<2x128xf32> -> vector<2x128xf32>
    %106 = arith.addf %104, %105 : vector<2x128xf32>
    %107 = vector.extract_strided_slice %106 {offsets = [0, 0], sizes = [2, 32], strides = [1, 1]} : vector<2x128xf32> to vector<2x32xf32>
    %108 = arith.negf %107 : vector<2x32xf32>
    %109 = math.exp %108 : vector<2x32xf32>
    %cst_29 = arith.constant 1.000000e+00 : f32
    %110 = vector.broadcast %cst_29 : f32 to vector<2x32xf32>
    %111 = arith.addf %110, %109 : vector<2x32xf32>
    %112 = arith.divf %110, %111 : vector<2x32xf32>
    %113 = vector.extract_strided_slice %106 {offsets = [0, 32], sizes = [2, 32], strides = [1, 1]} : vector<2x128xf32> to vector<2x32xf32>
    %114 = arith.negf %113 : vector<2x32xf32>
    %115 = math.exp %114 : vector<2x32xf32>
    %cst_30 = arith.constant 1.000000e+00 : f32
    %116 = vector.broadcast %cst_30 : f32 to vector<2x32xf32>
    %117 = arith.addf %116, %115 : vector<2x32xf32>
    %118 = arith.divf %116, %117 : vector<2x32xf32>
    %119 = vector.extract_strided_slice %106 {offsets = [0, 64], sizes = [2, 32], strides = [1, 1]} : vector<2x128xf32> to vector<2x32xf32>
    %120 = math.tanh %119 : vector<2x32xf32>
    %121 = vector.extract_strided_slice %106 {offsets = [0, 96], sizes = [2, 32], strides = [1, 1]} : vector<2x128xf32> to vector<2x32xf32>
    %122 = arith.negf %121 : vector<2x32xf32>
    %123 = math.exp %122 : vector<2x32xf32>
    %cst_31 = arith.constant 1.000000e+00 : f32
    %124 = vector.broadcast %cst_31 : f32 to vector<2x32xf32>
    %125 = arith.addf %124, %123 : vector<2x32xf32>
    %126 = arith.divf %124, %125 : vector<2x32xf32>
    %127 = arith.mulf %118, %96 : vector<2x32xf32>
    %128 = arith.mulf %112, %120 : vector<2x32xf32>
    %129 = arith.addf %127, %128 : vector<2x32xf32>
    %130 = math.tanh %129 : vector<2x32xf32>
    %131 = arith.mulf %126, %130 : vector<2x32xf32>
    %132 = vector.shape_cast %131 : vector<2x32xf32> to vector<2x1x32xf32>
    %c0_32 = arith.constant 0 : index
    %133 = arith.index_cast %c3_i32 : i32 to index
    %c0_33 = arith.constant 0 : index
    %134 = vector.load %arg3[%c0_32, %133, %c0_33] : memref<2x8x32xf32, #tpu.memory_space<vmem>>, vector<2x1x32xf32>
    tpu.vector_store %arg3[%c0_32, %133, %c0_33], %132 {strides = array<i32>} : memref<2x8x32xf32, #tpu.memory_space<vmem>>, vector<2x1x32xf32>,
    %c4_i32 = arith.constant 4 : i32
    %c0_34 = arith.constant 0 : index
    %135 = arith.index_cast %c4_i32 : i32 to index
    %c0_35 = arith.constant 0 : index
    %136 = vector.load %arg1[%c0_34, %135, %c0_35] : memref<2x8x128xf32, #tpu.memory_space<vmem>>, vector<2x1x128xf32>
    %137 = vector.shape_cast %136 : vector<2x1x128xf32> to vector<2x128xf32>
    %cst_36 = arith.constant dense<0.000000e+00> : vector<2x128xf32>
    %138 = tpu.matmul %131, %0, %cst_36 {dimension_numbers = #tpu.dot_dimension_numbers<[1], [0], [0], [1], [0, 0, 1, 1], [], []>} : vector<2x32xf32>, vector<32x128xf32>, vector<2x128xf32> -> vector<2x128xf32>
    %139 = arith.addf %137, %138 : vector<2x128xf32>
    %140 = vector.extract_strided_slice %139 {offsets = [0, 0], sizes = [2, 32], strides = [1, 1]} : vector<2x128xf32> to vector<2x32xf32>
    %141 = arith.negf %140 : vector<2x32xf32>
    %142 = math.exp %141 : vector<2x32xf32>
    %cst_37 = arith.constant 1.000000e+00 : f32
    %143 = vector.broadcast %cst_37 : f32 to vector<2x32xf32>
    %144 = arith.addf %143, %142 : vector<2x32xf32>
    %145 = arith.divf %143, %144 : vector<2x32xf32>
    %146 = vector.extract_strided_slice %139 {offsets = [0, 32], sizes = [2, 32], strides = [1, 1]} : vector<2x128xf32> to vector<2x32xf32>
    %147 = arith.negf %146 : vector<2x32xf32>
    %148 = math.exp %147 : vector<2x32xf32>
    %cst_38 = arith.constant 1.000000e+00 : f32
    %149 = vector.broadcast %cst_38 : f32 to vector<2x32xf32>
    %150 = arith.addf %149, %148 : vector<2x32xf32>
    %151 = arith.divf %149, %150 : vector<2x32xf32>
    %152 = vector.extract_strided_slice %139 {offsets = [0, 64], sizes = [2, 32], strides = [1, 1]} : vector<2x128xf32> to vector<2x32xf32>
    %153 = math.tanh %152 : vector<2x32xf32>
    %154 = vector.extract_strided_slice %139 {offsets = [0, 96], sizes = [2, 32], strides = [1, 1]} : vector<2x128xf32> to vector<2x32xf32>
    %155 = arith.negf %154 : vector<2x32xf32>
    %156 = math.exp %155 : vector<2x32xf32>
    %cst_39 = arith.constant 1.000000e+00 : f32
    %157 = vector.broadcast %cst_39 : f32 to vector<2x32xf32>
    %158 = arith.addf %157, %156 : vector<2x32xf32>
    %159 = arith.divf %157, %158 : vector<2x32xf32>
    %160 = arith.mulf %151, %129 : vector<2x32xf32>
    %161 = arith.mulf %145, %153 : vector<2x32xf32>
    %162 = arith.addf %160, %161 : vector<2x32xf32>
    %163 = math.tanh %162 : vector<2x32xf32>
    %164 = arith.mulf %159, %163 : vector<2x32xf32>
    %165 = vector.shape_cast %164 : vector<2x32xf32> to vector<2x1x32xf32>
    %c0_40 = arith.constant 0 : index
    %166 = arith.index_cast %c4_i32 : i32 to index
    %c0_41 = arith.constant 0 : index
    %167 = vector.load %arg3[%c0_40, %166, %c0_41] : memref<2x8x32xf32, #tpu.memory_space<vmem>>, vector<2x1x32xf32>
    tpu.vector_store %arg3[%c0_40, %166, %c0_41], %165 {strides = array<i32>} : memref<2x8x32xf32, #tpu.memory_space<vmem>>, vector<2x1x32xf32>,
    %c5_i32 = arith.constant 5 : i32
    %c0_42 = arith.constant 0 : index
    %168 = arith.index_cast %c5_i32 : i32 to index
    %c0_43 = arith.constant 0 : index
    %169 = vector.load %arg1[%c0_42, %168, %c0_43] : memref<2x8x128xf32, #tpu.memory_space<vmem>>, vector<2x1x128xf32>
    %170 = vector.shape_cast %169 : vector<2x1x128xf32> to vector<2x128xf32>
    %cst_44 = arith.constant dense<0.000000e+00> : vector<2x128xf32>
    %171 = tpu.matmul %164, %0, %cst_44 {dimension_numbers = #tpu.dot_dimension_numbers<[1], [0], [0], [1], [0, 0, 1, 1], [], []>} : vector<2x32xf32>, vector<32x128xf32>, vector<2x128xf32> -> vector<2x128xf32>
    %172 = arith.addf %170, %171 : vector<2x128xf32>
    %173 = vector.extract_strided_slice %172 {offsets = [0, 0], sizes = [2, 32], strides = [1, 1]} : vector<2x128xf32> to vector<2x32xf32>
    %174 = arith.negf %173 : vector<2x32xf32>
    %175 = math.exp %174 : vector<2x32xf32>
    %cst_45 = arith.constant 1.000000e+00 : f32
    %176 = vector.broadcast %cst_45 : f32 to vector<2x32xf32>
    %177 = arith.addf %176, %175 : vector<2x32xf32>
    %178 = arith.divf %176, %177 : vector<2x32xf32>
    %179 = vector.extract_strided_slice %172 {offsets = [0, 32], sizes = [2, 32], strides = [1, 1]} : vector<2x128xf32> to vector<2x32xf32>
    %180 = arith.negf %179 : vector<2x32xf32>
    %181 = math.exp %180 : vector<2x32xf32>
    %cst_46 = arith.constant 1.000000e+00 : f32
    %182 = vector.broadcast %cst_46 : f32 to vector<2x32xf32>
    %183 = arith.addf %182, %181 : vector<2x32xf32>
    %184 = arith.divf %182, %183 : vector<2x32xf32>
    %185 = vector.extract_strided_slice %172 {offsets = [0, 64], sizes = [2, 32], strides = [1, 1]} : vector<2x128xf32> to vector<2x32xf32>
    %186 = math.tanh %185 : vector<2x32xf32>
    %187 = vector.extract_strided_slice %172 {offsets = [0, 96], sizes = [2, 32], strides = [1, 1]} : vector<2x128xf32> to vector<2x32xf32>
    %188 = arith.negf %187 : vector<2x32xf32>
    %189 = math.exp %188 : vector<2x32xf32>
    %cst_47 = arith.constant 1.000000e+00 : f32
    %190 = vector.broadcast %cst_47 : f32 to vector<2x32xf32>
    %191 = arith.addf %190, %189 : vector<2x32xf32>
    %192 = arith.divf %190, %191 : vector<2x32xf32>
    %193 = arith.mulf %184, %162 : vector<2x32xf32>
    %194 = arith.mulf %178, %186 : vector<2x32xf32>
    %195 = arith.addf %193, %194 : vector<2x32xf32>
    %196 = math.tanh %195 : vector<2x32xf32>
    %197 = arith.mulf %192, %196 : vector<2x32xf32>
    %198 = vector.shape_cast %197 : vector<2x32xf32> to vector<2x1x32xf32>
    %c0_48 = arith.constant 0 : index
    %199 = arith.index_cast %c5_i32 : i32 to index
    %c0_49 = arith.constant 0 : index
    %200 = vector.load %arg3[%c0_48, %199, %c0_49] : memref<2x8x32xf32, #tpu.memory_space<vmem>>, vector<2x1x32xf32>
    tpu.vector_store %arg3[%c0_48, %199, %c0_49], %198 {strides = array<i32>} : memref<2x8x32xf32, #tpu.memory_space<vmem>>, vector<2x1x32xf32>,
    %c6_i32 = arith.constant 6 : i32
    %c0_50 = arith.constant 0 : index
    %201 = arith.index_cast %c6_i32 : i32 to index
    %c0_51 = arith.constant 0 : index
    %202 = vector.load %arg1[%c0_50, %201, %c0_51] : memref<2x8x128xf32, #tpu.memory_space<vmem>>, vector<2x1x128xf32>
    %203 = vector.shape_cast %202 : vector<2x1x128xf32> to vector<2x128xf32>
    %cst_52 = arith.constant dense<0.000000e+00> : vector<2x128xf32>
    %204 = tpu.matmul %197, %0, %cst_52 {dimension_numbers = #tpu.dot_dimension_numbers<[1], [0], [0], [1], [0, 0, 1, 1], [], []>} : vector<2x32xf32>, vector<32x128xf32>, vector<2x128xf32> -> vector<2x128xf32>
    %205 = arith.addf %203, %204 : vector<2x128xf32>
    %206 = vector.extract_strided_slice %205 {offsets = [0, 0], sizes = [2, 32], strides = [1, 1]} : vector<2x128xf32> to vector<2x32xf32>
    %207 = arith.negf %206 : vector<2x32xf32>
    %208 = math.exp %207 : vector<2x32xf32>
    %cst_53 = arith.constant 1.000000e+00 : f32
    %209 = vector.broadcast %cst_53 : f32 to vector<2x32xf32>
    %210 = arith.addf %209, %208 : vector<2x32xf32>
    %211 = arith.divf %209, %210 : vector<2x32xf32>
    %212 = vector.extract_strided_slice %205 {offsets = [0, 32], sizes = [2, 32], strides = [1, 1]} : vector<2x128xf32> to vector<2x32xf32>
    %213 = arith.negf %212 : vector<2x32xf32>
    %214 = math.exp %213 : vector<2x32xf32>
    %cst_54 = arith.constant 1.000000e+00 : f32
    %215 = vector.broadcast %cst_54 : f32 to vector<2x32xf32>
    %216 = arith.addf %215, %214 : vector<2x32xf32>
    %217 = arith.divf %215, %216 : vector<2x32xf32>
    %218 = vector.extract_strided_slice %205 {offsets = [0, 64], sizes = [2, 32], strides = [1, 1]} : vector<2x128xf32> to vector<2x32xf32>
    %219 = math.tanh %218 : vector<2x32xf32>
    %220 = vector.extract_strided_slice %205 {offsets = [0, 96], sizes = [2, 32], strides = [1, 1]} : vector<2x128xf32> to vector<2x32xf32>
    %221 = arith.negf %220 : vector<2x32xf32>
    %222 = math.exp %221 : vector<2x32xf32>
    %cst_55 = arith.constant 1.000000e+00 : f32
    %223 = vector.broadcast %cst_55 : f32 to vector<2x32xf32>
    %224 = arith.addf %223, %222 : vector<2x32xf32>
    %225 = arith.divf %223, %224 : vector<2x32xf32>
    %226 = arith.mulf %217, %195 : vector<2x32xf32>
    %227 = arith.mulf %211, %219 : vector<2x32xf32>
    %228 = arith.addf %226, %227 : vector<2x32xf32>
    %229 = math.tanh %228 : vector<2x32xf32>
    %230 = arith.mulf %225, %229 : vector<2x32xf32>
    %231 = vector.shape_cast %230 : vector<2x32xf32> to vector<2x1x32xf32>
    %c0_56 = arith.constant 0 : index
    %232 = arith.index_cast %c6_i32 : i32 to index
    %c0_57 = arith.constant 0 : index
    %233 = vector.load %arg3[%c0_56, %232, %c0_57] : memref<2x8x32xf32, #tpu.memory_space<vmem>>, vector<2x1x32xf32>
    tpu.vector_store %arg3[%c0_56, %232, %c0_57], %231 {strides = array<i32>} : memref<2x8x32xf32, #tpu.memory_space<vmem>>, vector<2x1x32xf32>,
    %c7_i32 = arith.constant 7 : i32
    %c0_58 = arith.constant 0 : index
    %234 = arith.index_cast %c7_i32 : i32 to index
    %c0_59 = arith.constant 0 : index
    %235 = vector.load %arg1[%c0_58, %234, %c0_59] : memref<2x8x128xf32, #tpu.memory_space<vmem>>, vector<2x1x128xf32>
    %236 = vector.shape_cast %235 : vector<2x1x128xf32> to vector<2x128xf32>
    %cst_60 = arith.constant dense<0.000000e+00> : vector<2x128xf32>
    %237 = tpu.matmul %230, %0, %cst_60 {dimension_numbers = #tpu.dot_dimension_numbers<[1], [0], [0], [1], [0, 0, 1, 1], [], []>} : vector<2x32xf32>, vector<32x128xf32>, vector<2x128xf32> -> vector<2x128xf32>
    %238 = arith.addf %236, %237 : vector<2x128xf32>
    %239 = vector.extract_strided_slice %238 {offsets = [0, 0], sizes = [2, 32], strides = [1, 1]} : vector<2x128xf32> to vector<2x32xf32>
    %240 = arith.negf %239 : vector<2x32xf32>
    %241 = math.exp %240 : vector<2x32xf32>
    %cst_61 = arith.constant 1.000000e+00 : f32
    %242 = vector.broadcast %cst_61 : f32 to vector<2x32xf32>
    %243 = arith.addf %242, %241 : vector<2x32xf32>
    %244 = arith.divf %242, %243 : vector<2x32xf32>
    %245 = vector.extract_strided_slice %238 {offsets = [0, 32], sizes = [2, 32], strides = [1, 1]} : vector<2x128xf32> to vector<2x32xf32>
    %246 = arith.negf %245 : vector<2x32xf32>
    %247 = math.exp %246 : vector<2x32xf32>
    %cst_62 = arith.constant 1.000000e+00 : f32
    %248 = vector.broadcast %cst_62 : f32 to vector<2x32xf32>
    %249 = arith.addf %248, %247 : vector<2x32xf32>
    %250 = arith.divf %248, %249 : vector<2x32xf32>
    %251 = vector.extract_strided_slice %238 {offsets = [0, 64], sizes = [2, 32], strides = [1, 1]} : vector<2x128xf32> to vector<2x32xf32>
    %252 = math.tanh %251 : vector<2x32xf32>
    %253 = vector.extract_strided_slice %238 {offsets = [0, 96], sizes = [2, 32], strides = [1, 1]} : vector<2x128xf32> to vector<2x32xf32>
    %254 = arith.negf %253 : vector<2x32xf32>
    %255 = math.exp %254 : vector<2x32xf32>
    %cst_63 = arith.constant 1.000000e+00 : f32
    %256 = vector.broadcast %cst_63 : f32 to vector<2x32xf32>
    %257 = arith.addf %256, %255 : vector<2x32xf32>
    %258 = arith.divf %256, %257 : vector<2x32xf32>
    %259 = arith.mulf %250, %228 : vector<2x32xf32>
    %260 = arith.mulf %244, %252 : vector<2x32xf32>
    %261 = arith.addf %259, %260 : vector<2x32xf32>
    %262 = math.tanh %261 : vector<2x32xf32>
    %263 = arith.mulf %258, %262 : vector<2x32xf32>
    %264 = vector.shape_cast %263 : vector<2x32xf32> to vector<2x1x32xf32>
    %c0_64 = arith.constant 0 : index
    %265 = arith.index_cast %c7_i32 : i32 to index
    %c0_65 = arith.constant 0 : index
    %266 = vector.load %arg3[%c0_64, %265, %c0_65] : memref<2x8x32xf32, #tpu.memory_space<vmem>>, vector<2x1x32xf32>
    tpu.vector_store %arg3[%c0_64, %265, %c0_65], %264 {strides = array<i32>} : memref<2x8x32xf32, #tpu.memory_space<vmem>>, vector<2x1x32xf32>,
    %c8_i32 = arith.constant 8 : i32
    %c0_66 = arith.constant 0 : index
    %c0_67 = arith.constant 0 : index
    %267 = vector.load %arg4[%c0_66, %c0_67] : memref<2x32xf32, #tpu.memory_space<vmem>>, vector<2x32xf32>
    tpu.vector_store %arg4[%c0_66, %c0_67], %261 {strides = array<i32>} : memref<2x32xf32, #tpu.memory_space<vmem>>, vector<2x32xf32>,
    return
  }
  func.func @transform_0(%arg0: i32) -> (i32, i32, i32) {
    %c0_i32 = arith.constant 0 : i32
    %c0_i32_0 = arith.constant 0 : i32
    %c0_i32_1 = arith.constant 0 : i32
    return %arg0, %c0_i32, %c0_i32_0 : i32, i32, i32
  }
  func.func @transform_1(%arg0: i32) -> (i32, i32) {
    %c0_i32 = arith.constant 0 : i32
    %c0_i32_0 = arith.constant 0 : i32
    %c0_i32_1 = arith.constant 0 : i32
    return %c0_i32, %c0_i32_0 : i32, i32
  }
  func.func @transform_2(%arg0: i32) -> (i32, i32, i32) {
    %c0_i32 = arith.constant 0 : i32
    %c0_i32_0 = arith.constant 0 : i32
    %c0_i32_1 = arith.constant 0 : i32
    return %arg0, %c0_i32, %c0_i32_0 : i32, i32, i32
  }
  func.func @transform_3(%arg0: i32) -> (i32, i32) {
    %c0_i32 = arith.constant 0 : i32
    %c0_i32_0 = arith.constant 0 : i32
    return %arg0, %c0_i32 : i32, i32
  }
}

module attributes {stable_mosaic.version = 11 : i64} {
  func.func @prep_kernel(%arg0: i32, %arg1: memref<2x8x4xf32, #tpu.memory_space<vmem>>, %arg2: memref<4x32xf32, #tpu.memory_space<vmem>>, %arg3: memref<1x32xf32, #tpu.memory_space<vmem>>, %arg4: memref<32x96xf32, #tpu.memory_space<vmem>>, %arg5: memref<1x96xf32, #tpu.memory_space<vmem>>, %arg6: memref<8x8xf32, #tpu.memory_space<vmem>>, %arg7: memref<32x32xf32, #tpu.memory_space<vmem>>, %arg8: memref<1x32xf32, #tpu.memory_space<vmem>>, %arg9: memref<1x32xf32, #tpu.memory_space<vmem>>, %arg10: memref<1x32xf32, #tpu.memory_space<vmem>>, %arg11: memref<1x32xf32, #tpu.memory_space<vmem>>, %arg12: memref<1x32xf32, #tpu.memory_space<vmem>>, %arg13: memref<32x128xf32, #tpu.memory_space<vmem>>, %arg14: memref<1x128xf32, #tpu.memory_space<vmem>>, %arg15: memref<2x8x128xf32, #tpu.memory_space<vmem>>) attributes {dimension_semantics = [#tpu.dimension_semantics<parallel>], iteration_bounds = array<i64: 1>, scalar_prefetch = 0 : i64, scratch_operands = 0 : i64, tpu.core_type = #tpu.core_type<tc>, window_params = [{transform_indices = @transform_0, window_bounds = array<i64: 2, 8, 4>}, {pipeline_mode = #tpu.pipeline_mode<synchronous>, transform_indices = @transform_1, window_bounds = array<i64: 4, 32>}, {pipeline_mode = #tpu.pipeline_mode<synchronous>, transform_indices = @transform_2, window_bounds = array<i64: 1, 32>}, {pipeline_mode = #tpu.pipeline_mode<synchronous>, transform_indices = @transform_3, window_bounds = array<i64: 32, 96>}, {pipeline_mode = #tpu.pipeline_mode<synchronous>, transform_indices = @transform_4, window_bounds = array<i64: 1, 96>}, {pipeline_mode = #tpu.pipeline_mode<synchronous>, transform_indices = @transform_5, window_bounds = array<i64: 8, 8>}, {pipeline_mode = #tpu.pipeline_mode<synchronous>, transform_indices = @transform_6, window_bounds = array<i64: 32, 32>}, {pipeline_mode = #tpu.pipeline_mode<synchronous>, transform_indices = @transform_7, window_bounds = array<i64: 1, 32>}, {pipeline_mode = #tpu.pipeline_mode<synchronous>, transform_indices = @transform_8, window_bounds = array<i64: 1, 32>}, {pipeline_mode = #tpu.pipeline_mode<synchronous>, transform_indices = @transform_9, window_bounds = array<i64: 1, 32>}, {pipeline_mode = #tpu.pipeline_mode<synchronous>, transform_indices = @transform_10, window_bounds = array<i64: 1, 32>}, {pipeline_mode = #tpu.pipeline_mode<synchronous>, transform_indices = @transform_11, window_bounds = array<i64: 1, 32>}, {pipeline_mode = #tpu.pipeline_mode<synchronous>, transform_indices = @transform_12, window_bounds = array<i64: 32, 128>}, {pipeline_mode = #tpu.pipeline_mode<synchronous>, transform_indices = @transform_13, window_bounds = array<i64: 1, 128>}, {transform_indices = @transform_14, window_bounds = array<i64: 2, 8, 128>}]} {
    %c0 = arith.constant 0 : index
    %c0_0 = arith.constant 0 : index
    %c0_1 = arith.constant 0 : index
    %0 = vector.load %arg1[%c0, %c0_0, %c0_1] : memref<2x8x4xf32, #tpu.memory_space<vmem>>, vector<2x8x4xf32>
    %1 = vector.shape_cast %0 : vector<2x8x4xf32> to vector<16x4xf32>
    %c0_2 = arith.constant 0 : index
    %c0_3 = arith.constant 0 : index
    %2 = vector.load %arg2[%c0_2, %c0_3] : memref<4x32xf32, #tpu.memory_space<vmem>>, vector<4x32xf32>
    %cst = arith.constant dense<0.000000e+00> : vector<16x32xf32>
    %3 = tpu.matmul %1, %2, %cst {dimension_numbers = #tpu.dot_dimension_numbers<[1], [0], [0], [1], [0, 0, 1, 1], [], []>} : vector<16x4xf32>, vector<4x32xf32>, vector<16x32xf32> -> vector<16x32xf32>
    %c0_4 = arith.constant 0 : index
    %c0_5 = arith.constant 0 : index
    %4 = vector.load %arg3[%c0_4, %c0_5] : memref<1x32xf32, #tpu.memory_space<vmem>>, vector<1x32xf32>
    %5 = vector.broadcast %4 : vector<1x32xf32> to vector<16x32xf32>
    %6 = arith.addf %3, %5 : vector<16x32xf32>
    %c0_6 = arith.constant 0 : index
    %c0_7 = arith.constant 0 : index
    %7 = vector.load %arg4[%c0_6, %c0_7] : memref<32x96xf32, #tpu.memory_space<vmem>>, vector<32x96xf32>
    %cst_8 = arith.constant dense<0.000000e+00> : vector<16x96xf32>
    %8 = tpu.matmul %6, %7, %cst_8 {dimension_numbers = #tpu.dot_dimension_numbers<[1], [0], [0], [1], [0, 0, 1, 1], [], []>} : vector<16x32xf32>, vector<32x96xf32>, vector<16x96xf32> -> vector<16x96xf32>
    %c0_9 = arith.constant 0 : index
    %c0_10 = arith.constant 0 : index
    %9 = vector.load %arg5[%c0_9, %c0_10] : memref<1x96xf32, #tpu.memory_space<vmem>>, vector<1x96xf32>
    %10 = vector.broadcast %9 : vector<1x96xf32> to vector<16x96xf32>
    %11 = arith.addf %8, %10 : vector<16x96xf32>
    %12 = vector.extract_strided_slice %11 {offsets = [0, 0], sizes = [16, 32], strides = [1, 1]} : vector<16x96xf32> to vector<16x32xf32>
    %13 = vector.extract_strided_slice %11 {offsets = [0, 32], sizes = [16, 32], strides = [1, 1]} : vector<16x96xf32> to vector<16x32xf32>
    %14 = vector.extract_strided_slice %11 {offsets = [0, 64], sizes = [16, 32], strides = [1, 1]} : vector<16x96xf32> to vector<16x32xf32>
    %15 = math.exp %13 : vector<16x32xf32>
    %c0_11 = arith.constant 0 : index
    %c0_12 = arith.constant 0 : index
    %16 = vector.load %arg6[%c0_11, %c0_12] : memref<8x8xf32, #tpu.memory_space<vmem>>, vector<8x8xf32>
    %17 = vector.shape_cast %16 : vector<8x8xf32> to vector<1x8x8xf32>
    %18 = vector.broadcast %17 : vector<1x8x8xf32> to vector<2x8x8xf32>
    %19 = arith.mulf %15, %14 : vector<16x32xf32>
    %20 = vector.shape_cast %19 : vector<16x32xf32> to vector<2x8x32xf32>
    "tpu.trace_start"() <{level = 10 : i32, message = "bts,bsh->bth"}> : () -> ()
    %cst_13 = arith.constant dense<0.000000e+00> : vector<2x8x32xf32>
    %21 = tpu.matmul %18, %20, %cst_13 {dimension_numbers = #tpu.dot_dimension_numbers<[2], [1], [1], [2], [0, 0, 0, 1, 1, 2], [0], [0]>} : vector<2x8x8xf32>, vector<2x8x32xf32>, vector<2x8x32xf32> -> vector<2x8x32xf32>
    "tpu.trace_stop"() : () -> ()
    %22 = vector.shape_cast %15 : vector<16x32xf32> to vector<2x8x32xf32>
    "tpu.trace_start"() <{level = 10 : i32, message = "bts,bsh->bth"}> : () -> ()
    %cst_14 = arith.constant dense<0.000000e+00> : vector<2x8x32xf32>
    %23 = tpu.matmul %18, %22, %cst_14 {dimension_numbers = #tpu.dot_dimension_numbers<[2], [1], [1], [2], [0, 0, 0, 1, 1, 2], [0], [0]>} : vector<2x8x8xf32>, vector<2x8x32xf32>, vector<2x8x32xf32> -> vector<2x8x32xf32>
    "tpu.trace_stop"() : () -> ()
    %24 = arith.negf %12 : vector<16x32xf32>
    %25 = math.exp %24 : vector<16x32xf32>
    %cst_15 = arith.constant 1.000000e+00 : f32
    %26 = vector.broadcast %cst_15 : f32 to vector<16x32xf32>
    %27 = arith.addf %26, %25 : vector<16x32xf32>
    %28 = arith.divf %26, %27 : vector<16x32xf32>
    %29 = vector.shape_cast %21 : vector<2x8x32xf32> to vector<16x32xf32>
    %30 = vector.shape_cast %23 : vector<2x8x32xf32> to vector<16x32xf32>
    %31 = arith.divf %29, %30 : vector<16x32xf32>
    %32 = arith.mulf %28, %31 : vector<16x32xf32>
    %c0_16 = arith.constant 0 : index
    %c0_17 = arith.constant 0 : index
    %33 = vector.load %arg7[%c0_16, %c0_17] : memref<32x32xf32, #tpu.memory_space<vmem>>, vector<32x32xf32>
    %cst_18 = arith.constant dense<0.000000e+00> : vector<16x32xf32>
    %34 = tpu.matmul %32, %33, %cst_18 {dimension_numbers = #tpu.dot_dimension_numbers<[1], [0], [0], [1], [0, 0, 1, 1], [], []>} : vector<16x32xf32>, vector<32x32xf32>, vector<16x32xf32> -> vector<16x32xf32>
    %c0_19 = arith.constant 0 : index
    %c0_20 = arith.constant 0 : index
    %35 = vector.load %arg8[%c0_19, %c0_20] : memref<1x32xf32, #tpu.memory_space<vmem>>, vector<1x32xf32>
    %36 = vector.broadcast %35 : vector<1x32xf32> to vector<16x32xf32>
    %37 = arith.addf %34, %36 : vector<16x32xf32>
    %cst_21 = arith.constant 0.000000e+00 : f32
    %38 = vector.broadcast %cst_21 : f32 to vector<16x32xf32>
    %39 = arith.maximumf %37, %38 : vector<16x32xf32>
    %c0_22 = arith.constant 0 : index
    %c0_23 = arith.constant 0 : index
    %40 = vector.load %arg9[%c0_22, %c0_23] : memref<1x32xf32, #tpu.memory_space<vmem>>, vector<1x32xf32>
    %c0_24 = arith.constant 0 : index
    %c0_25 = arith.constant 0 : index
    %41 = vector.load %arg10[%c0_24, %c0_25] : memref<1x32xf32, #tpu.memory_space<vmem>>, vector<1x32xf32>
    %cst_26 = arith.constant dense<0.000000e+00> : vector<16xf32>
    %42 = vector.multi_reduction <add>, %37, %cst_26 [1] : vector<16x32xf32> to vector<16xf32>
    %43 = vector.shape_cast %42 : vector<16xf32> to vector<16x1xf32>
    %cst_27 = arith.constant 3.200000e+01 : f32
    %44 = vector.broadcast %cst_27 : f32 to vector<16x1xf32>
    %45 = arith.divf %43, %44 : vector<16x1xf32>
    %46 = vector.broadcast %45 : vector<16x1xf32> to vector<16x32xf32>
    %47 = arith.subf %37, %46 : vector<16x32xf32>
    %48 = arith.mulf %47, %47 : vector<16x32xf32>
    %cst_28 = arith.constant dense<0.000000e+00> : vector<16xf32>
    %49 = vector.multi_reduction <add>, %48, %cst_28 [1] : vector<16x32xf32> to vector<16xf32>
    %50 = vector.shape_cast %49 : vector<16xf32> to vector<16x1xf32>
    %cst_29 = arith.constant 3.200000e+01 : f32
    %51 = vector.broadcast %cst_29 : f32 to vector<16x1xf32>
    %52 = arith.divf %50, %51 : vector<16x1xf32>
    %53 = vector.broadcast %45 : vector<16x1xf32> to vector<16x32xf32>
    %54 = arith.subf %37, %53 : vector<16x32xf32>
    %cst_30 = arith.constant 9.99999974E-6 : f32
    %55 = vector.broadcast %cst_30 : f32 to vector<16x1xf32>
    %56 = arith.addf %52, %55 : vector<16x1xf32>
    %57 = math.rsqrt %56 : vector<16x1xf32>
    %58 = vector.broadcast %57 : vector<16x1xf32> to vector<16x32xf32>
    %59 = arith.mulf %54, %58 : vector<16x32xf32>
    %60 = vector.broadcast %40 : vector<1x32xf32> to vector<16x32xf32>
    %61 = arith.mulf %59, %60 : vector<16x32xf32>
    %62 = vector.broadcast %41 : vector<1x32xf32> to vector<16x32xf32>
    %63 = arith.addf %61, %62 : vector<16x32xf32>
    %64 = arith.mulf %39, %63 : vector<16x32xf32>
    %c0_31 = arith.constant 0 : index
    %c0_32 = arith.constant 0 : index
    %65 = vector.load %arg11[%c0_31, %c0_32] : memref<1x32xf32, #tpu.memory_space<vmem>>, vector<1x32xf32>
    %c0_33 = arith.constant 0 : index
    %c0_34 = arith.constant 0 : index
    %66 = vector.load %arg12[%c0_33, %c0_34] : memref<1x32xf32, #tpu.memory_space<vmem>>, vector<1x32xf32>
    %cst_35 = arith.constant dense<0.000000e+00> : vector<16xf32>
    %67 = vector.multi_reduction <add>, %64, %cst_35 [1] : vector<16x32xf32> to vector<16xf32>
    %68 = vector.shape_cast %67 : vector<16xf32> to vector<16x1xf32>
    %cst_36 = arith.constant 3.200000e+01 : f32
    %69 = vector.broadcast %cst_36 : f32 to vector<16x1xf32>
    %70 = arith.divf %68, %69 : vector<16x1xf32>
    %71 = vector.broadcast %70 : vector<16x1xf32> to vector<16x32xf32>
    %72 = arith.subf %64, %71 : vector<16x32xf32>
    %73 = arith.mulf %72, %72 : vector<16x32xf32>
    %cst_37 = arith.constant dense<0.000000e+00> : vector<16xf32>
    %74 = vector.multi_reduction <add>, %73, %cst_37 [1] : vector<16x32xf32> to vector<16xf32>
    %75 = vector.shape_cast %74 : vector<16xf32> to vector<16x1xf32>
    %cst_38 = arith.constant 3.200000e+01 : f32
    %76 = vector.broadcast %cst_38 : f32 to vector<16x1xf32>
    %77 = arith.divf %75, %76 : vector<16x1xf32>
    %78 = vector.broadcast %70 : vector<16x1xf32> to vector<16x32xf32>
    %79 = arith.subf %64, %78 : vector<16x32xf32>
    %cst_39 = arith.constant 9.99999974E-6 : f32
    %80 = vector.broadcast %cst_39 : f32 to vector<16x1xf32>
    %81 = arith.addf %77, %80 : vector<16x1xf32>
    %82 = math.rsqrt %81 : vector<16x1xf32>
    %83 = vector.broadcast %82 : vector<16x1xf32> to vector<16x32xf32>
    %84 = arith.mulf %79, %83 : vector<16x32xf32>
    %85 = vector.broadcast %65 : vector<1x32xf32> to vector<16x32xf32>
    %86 = arith.mulf %84, %85 : vector<16x32xf32>
    %87 = vector.broadcast %66 : vector<1x32xf32> to vector<16x32xf32>
    %88 = arith.addf %86, %87 : vector<16x32xf32>
    %c0_40 = arith.constant 0 : index
    %c0_41 = arith.constant 0 : index
    %89 = vector.load %arg13[%c0_40, %c0_41] : memref<32x128xf32, #tpu.memory_space<vmem>>, vector<32x128xf32>
    %cst_42 = arith.constant dense<0.000000e+00> : vector<16x128xf32>
    %90 = tpu.matmul %88, %89, %cst_42 {dimension_numbers = #tpu.dot_dimension_numbers<[1], [0], [0], [1], [0, 0, 1, 1], [], []>} : vector<16x32xf32>, vector<32x128xf32>, vector<16x128xf32> -> vector<16x128xf32>
    %c0_43 = arith.constant 0 : index
    %c0_44 = arith.constant 0 : index
    %91 = vector.load %arg14[%c0_43, %c0_44] : memref<1x128xf32, #tpu.memory_space<vmem>>, vector<1x128xf32>
    %92 = vector.broadcast %91 : vector<1x128xf32> to vector<16x128xf32>
    %93 = arith.addf %90, %92 : vector<16x128xf32>
    %94 = vector.shape_cast %93 : vector<16x128xf32> to vector<2x8x128xf32>
    %c0_45 = arith.constant 0 : index
    %c0_46 = arith.constant 0 : index
    %c0_47 = arith.constant 0 : index
    %95 = vector.load %arg15[%c0_45, %c0_46, %c0_47] : memref<2x8x128xf32, #tpu.memory_space<vmem>>, vector<2x8x128xf32>
    tpu.vector_store %arg15[%c0_45, %c0_46, %c0_47], %94 {strides = array<i32>} : memref<2x8x128xf32, #tpu.memory_space<vmem>>, vector<2x8x128xf32>,
    return
  }
  func.func @transform_0(%arg0: i32) -> (i32, i32, i32) {
    %c0_i32 = arith.constant 0 : i32
    %c0_i32_0 = arith.constant 0 : i32
    %c0_i32_1 = arith.constant 0 : i32
    return %arg0, %c0_i32, %c0_i32_0 : i32, i32, i32
  }
  func.func @transform_1(%arg0: i32) -> (i32, i32) {
    %c0_i32 = arith.constant 0 : i32
    %c0_i32_0 = arith.constant 0 : i32
    %c0_i32_1 = arith.constant 0 : i32
    return %c0_i32, %c0_i32_0 : i32, i32
  }
  func.func @transform_2(%arg0: i32) -> (i32, i32) {
    %c0_i32 = arith.constant 0 : i32
    %c0_i32_0 = arith.constant 0 : i32
    %c0_i32_1 = arith.constant 0 : i32
    return %c0_i32, %c0_i32_0 : i32, i32
  }
  func.func @transform_3(%arg0: i32) -> (i32, i32) {
    %c0_i32 = arith.constant 0 : i32
    %c0_i32_0 = arith.constant 0 : i32
    %c0_i32_1 = arith.constant 0 : i32
    return %c0_i32, %c0_i32_0 : i32, i32
  }
  func.func @transform_4(%arg0: i32) -> (i32, i32) {
    %c0_i32 = arith.constant 0 : i32
    %c0_i32_0 = arith.constant 0 : i32
    %c0_i32_1 = arith.constant 0 : i32
    return %c0_i32, %c0_i32_0 : i32, i32
  }
  func.func @transform_5(%arg0: i32) -> (i32, i32) {
    %c0_i32 = arith.constant 0 : i32
    %c0_i32_0 = arith.constant 0 : i32
    %c0_i32_1 = arith.constant 0 : i32
    return %c0_i32, %c0_i32_0 : i32, i32
  }
  func.func @transform_6(%arg0: i32) -> (i32, i32) {
    %c0_i32 = arith.constant 0 : i32
    %c0_i32_0 = arith.constant 0 : i32
    %c0_i32_1 = arith.constant 0 : i32
    return %c0_i32, %c0_i32_0 : i32, i32
  }
  func.func @transform_7(%arg0: i32) -> (i32, i32) {
    %c0_i32 = arith.constant 0 : i32
    %c0_i32_0 = arith.constant 0 : i32
    %c0_i32_1 = arith.constant 0 : i32
    return %c0_i32, %c0_i32_0 : i32, i32
  }
  func.func @transform_8(%arg0: i32) -> (i32, i32) {
    %c0_i32 = arith.constant 0 : i32
    %c0_i32_0 = arith.constant 0 : i32
    %c0_i32_1 = arith.constant 0 : i32
    return %c0_i32, %c0_i32_0 : i32, i32
  }
  func.func @transform_9(%arg0: i32) -> (i32, i32) {
    %c0_i32 = arith.constant 0 : i32
    %c0_i32_0 = arith.constant 0 : i32
    %c0_i32_1 = arith.constant 0 : i32
    return %c0_i32, %c0_i32_0 : i32, i32
  }
  func.func @transform_10(%arg0: i32) -> (i32, i32) {
    %c0_i32 = arith.constant 0 : i32
    %c0_i32_0 = arith.constant 0 : i32
    %c0_i32_1 = arith.constant 0 : i32
    return %c0_i32, %c0_i32_0 : i32, i32
  }
  func.func @transform_11(%arg0: i32) -> (i32, i32) {
    %c0_i32 = arith.constant 0 : i32
    %c0_i32_0 = arith.constant 0 : i32
    %c0_i32_1 = arith.constant 0 : i32
    return %c0_i32, %c0_i32_0 : i32, i32
  }
  func.func @transform_12(%arg0: i32) -> (i32, i32) {
    %c0_i32 = arith.constant 0 : i32
    %c0_i32_0 = arith.constant 0 : i32
    %c0_i32_1 = arith.constant 0 : i32
    return %c0_i32, %c0_i32_0 : i32, i32
  }
  func.func @transform_13(%arg0: i32) -> (i32, i32) {
    %c0_i32 = arith.constant 0 : i32
    %c0_i32_0 = arith.constant 0 : i32
    %c0_i32_1 = arith.constant 0 : i32
    return %c0_i32, %c0_i32_0 : i32, i32
  }
  func.func @transform_14(%arg0: i32) -> (i32, i32, i32) {
    %c0_i32 = arith.constant 0 : i32
    %c0_i32_0 = arith.constant 0 : i32
    %c0_i32_1 = arith.constant 0 : i32
    return %arg0, %c0_i32, %c0_i32_0 : i32, i32, i32
  }
}

</mosaic_0001>

<bundles_post_ra>
// kernel: af_lstm_forward.3
= control target key start
LH: loop header
LB: loop body
LE: loop exit
PB: predicated region body
PF: predicated region fallthrough
CT: control target
= control target key end

     0   :  { %v1488_v1 = vmov 0.0   ;;  %vm1489_vm0 = vmmov 0   ;;  %s1876_s0 = inlined_call_operand.vmem [shape: f32[2,8,128], index: 0, kind: input, shape index: {}]   ;;  %s1877_s1 = inlined_call_operand.vmem [shape: f32[32,128], index: 1, kind: input, shape index: {}]   ;;  %s1878_s2 = inlined_call_operand.vmem [shape: f32[2,8,32], index: 2, kind: output, shape index: {0}]   ;;  %s1879_s3 = inlined_call_operand.hbm [shape: f32[2,32], index: 3, kind: output, shape index: {1}]  }
   0x1   :  { %v1517_v0 = vld [vmem:[%s1877_s1 + $0x18] sm:$0xff]  ;;  %1244 = vmatprep.subr.mxu0 %v1488_v1  ;;  %v1523_v2 = vld [vmem:[%s1877_s1 + $0x10] sm:$0xff]  ;;  %1252 = vmatprep.mubr.msk.f32.mxu0 %vm1489_vm0, %v1488_v1 }
   0x2   :  { %1245 = vmatpush3.msra.mxu0 %v1517_v0  ;;  %1255 = vmatprep.subr.mxu1 %v1488_v1 }
   0x3   :  { %9 = vsyncpa [#allocation3], 0  ;;  %1246 = vmatprep.subr.mxu0 %v1488_v1  ;;  %v1533_v3 = vld [vmem:[%s1877_s1 + $0x8] sm:$0xff]  ;;  %1256 = vmatpush3.msra.mxu1 %v1517_v0  ;;  %v1542_v4 = vld [vmem:[%s1877_s1] sm:$0xff]  ;;  %s1490_s23 = smov 64   ;;  %s1491_s24 = smov 32  }
   0x4   :  { %1247 = vmatpush3.msra.mxu0 %v1523_v2  ;;  %1257 = vmatprep.subr.mxu1 %v1488_v1  ;;  %v19_v5 = vld [vmem:[%s1876_s0 + $0x8] sm:$0x1]  ;;  %v18_v9 = vld [vmem:[%s1876_s0] sm:$0x1]  ;;  %vm162_vm1 = vcmask 1041409   ;;  %vm20_vm2 = vcmask 261120  }
   0x5   :  { %1248 = vmatprep.subr.mxu0 %v1488_v1  ;;  %1258 = vmatpush3.msra.mxu1 %v1523_v2  ;;  %v159_v41 = vld [vmem:[%s1876_s0 + $0x1] sm:$0x1]  ;;  %v160_v42 = vld [vmem:[%s1876_s0 + $0x9] sm:$0x1]  ;;  %vm1161_vm3 = vcmask 254976   ;;  %vm156_vm4 = vcmask 253952  }
   0x6   :  { %1249 = vmatpush3.msra.mxu0 %v1533_v3  ;;  %1259 = vmatprep.subr.mxu1 %v1488_v1 }
   0x7   :  { %1250 = vmatprep.subr.mxu0 %v1488_v1  ;;  %1260 = vmatpush3.msra.mxu1 %v1533_v3 }
   0x8   :  { %1251 = vmatpush3.msra.mxu0 %v1542_v4  ;;  %1261 = vmatprep.subr.mxu1 %v1488_v1 }
   0x9   :  { %1253 = vmatmul.mubr.f32.vlgmr.msra.gmra.mxu0 %v1488_v1  ;;  %1262 = vmatpush3.msra.mxu1 %v1542_v4 }
   0xa   :  { %1263 = vmatprep.mubr.msk.f32.mxu1 %vm1489_vm0, %v1488_v1  ;;  %1266 = vmatprep.subr.mxu0 %v1488_v1 }
   0xb   :  { %1267 = vmatpush3.msra.mxu0 %v1517_v0  ;;  %1274 = vmatprep.mubr.msk.f32.mxu0 %vm1489_vm0, %v1488_v1 }
   0xc   :  { %1268 = vmatprep.subr.mxu0 %v1488_v1  ;;  %1277 = vmatprep.subr.mxu1 %v1488_v1 }
   0xd   :  { %1269 = vmatpush3.msra.mxu0 %v1523_v2 }
   0xe   :  { %1270 = vmatprep.subr.mxu0 %v1488_v1 }
   0xf   :  { %1271 = vmatpush3.msra.mxu0 %v1533_v3 }
  0x10   :  { %1272 = vmatprep.subr.mxu0 %v1488_v1 }
  0x11   :  { %1273 = vmatpush3.msra.mxu0 %v1542_v4 }
  0x12   :  { %1288 = vmatprep.subr.mxu0 %v1488_v1 }
  0xc9   :  { %v90_v6 = vpop.f32.mrf.mxu0 }
  0xca   :  { %v95_v7 = vrot.slane %v90_v6, 1  ;;  %v98_v11 = vadd.f32 %v90_v6, %v18_v9 }
  0xcb   :  { %v1254_v8 = vpop.f32.mrf.mxu0 }
  0xcc   :  { %v99_v10 = vadd.f32 %v95_v7, %v19_v5  ;;  %v1181_v15 = vmul.f32 -1.442695, %v98_v11 }
  0xce   :  { %1338 = vtanh.f32 %v99_v10  ;;  %v1182_v14 = vmul.f32 -1.442695, %v99_v10 }
  0xcf   :  { %1340 = vtanh.f32 %v98_v11 }
  0xd0   :  { %1342 = vpow2.f32 %v1182_v14 }
  0xd1   :  { %1344 = vpow2.f32 %v1181_v15 }
  0xdb   :  { %v1339_v12 = vpop.eup %1338 }
  0xdc   :  { %120 = vrot.lane.b32.xlu0 %v1339_v12, %s1490_s23  ;;  %v1341_v13 = vpop.eup %1340 }
  0xdd   :  { %v1343_v16 = vpop.eup %1342 }
  0xde   :  { %v107_v17 = vadd.f32 1.0, %v1343_v16  ;;  %v1345_v18 = vpop.eup %1344 }
  0xdf   :  { %v106_v19 = vadd.f32 1.0, %v1345_v18  ;;  %v302_v18 = vld [vmem:[%s1876_s0 + $0x2] sm:$0x1] }
  0xe0   :  { %118 = vrot.lane.b32.xlu0 %v1341_v13, %s1490_s23  ;;  %1346 = vrcp.f32 %v107_v17 }
  0xe1   :  { %1348 = vrcp.f32 %v106_v19  ;;  %v303_v19 = vld [vmem:[%s1876_s0 + $0xa] sm:$0x1] }
  0xed   :  { %v1347_v20 = vpop.eup %1346 }
  0xee   :  { %v1349_v23 = vpop.eup %1348  ;;  %v115_v26 = vmul.f32 0.0, %v1347_v20 }
  0xef   :  { %v114_v29 = vmul.f32 0.0, %v1349_v23 }
 0x14e   :  { %v121_v21 = vpop.permute.xlu0 %120 }
 0x14f   :  { %v125_v22 = vmul.f32 %v1347_v20, %v121_v21 }
 0x151   :  { %130 = vrot.lane.b32.xlu1 %v125_v22, %s1491_s24 }
 0x152   :  { %v119_v24 = vpop.permute.xlu0 %118 }
 0x153   :  { %v124_v25 = vmul.f32 %v1349_v23, %v119_v24 }
 0x155   :  { %128 = vrot.lane.b32.xlu1 %v124_v25, %s1491_s24 }
 0x1c3   :  { %v131_v27 = vpop.permute.xlu1 %130 }
 0x1c4   :  { %v1577_v28 = vadd.f32 %v131_v27, %v115_v26 }
 0x1c6   :  { %1350 = vtanh.f32 %v1577_v28 }
 0x1c7   :  { %v129_v30 = vpop.permute.xlu1 %128 }
 0x1c8   :  { %v134_v31 = vadd.f32 %v129_v30, %v114_v29 }
 0x1ca   :  { %1352 = vtanh.f32 %v134_v31 }
 0x1d3   :  { %v1351_v32 = vpop.eup %1350 }
 0x1d4   :  { %142 = vrot.lane.b32.xlu0 %v1351_v32, %s1490_s23 }
 0x1d7   :  { %v1353_v33 = vpop.eup %1352 }
 0x1d8   :  { %140 = vrot.lane.b32.xlu1 %v1353_v33, %s1490_s23 }
 0x246   :  { %v143_v34 = vpop.permute.xlu0 %142 }
 0x247   :  { %v1582_v35 = vmul.f32 %v1347_v20, %v143_v34 }
 0x249   :  { %v161_v37 = vrot.slane %v1582_v35, 7 }
 0x24a   :  { %v141_v36 = vpop.permute.xlu1 %140 }
 0x24b   :  { %v1585_v38 = vmul.f32 %v1349_v23, %v141_v36 }
 0x24d   :  { %v163_v39 = vsel %vm162_vm1, %v161_v37, %v1585_v38 }
 0x24e   :  { %164 = vrot.lane.b32.xlu0 %v163_v39, %s1491_s24 }
 0x2c0   :  { %v165_v40 = vpop.permute.xlu0 %164 }
 0x2c1   :  { %1264 = vmatmul.mubr.msk.f32.vlgmr.msra.gmra.mxu1 %vm20_vm2, %v165_v40 }
 0x2c2   :  { %1278 = vmatpush3.msra.mxu1 %v1517_v0  ;;  %1285 = vmatprep.mubr.msk.f32.mxu1 %vm1489_vm0, %v1488_v1 }
 0x2c3   :  { %1279 = vmatprep.subr.mxu1 %v1488_v1 }
 0x2c4   :  { %1280 = vmatpush3.msra.mxu1 %v1523_v2 }
 0x2c5   :  { %1281 = vmatprep.subr.mxu1 %v1488_v1 }
 0x2c6   :  { %1282 = vmatpush3.msra.mxu1 %v1533_v3 }
 0x2c7   :  { %1283 = vmatprep.subr.mxu1 %v1488_v1 }
 0x2c8   :  { %1284 = vmatpush3.msra.mxu1 %v1542_v4 }
 0x2c9   :  { %1299 = vmatprep.subr.mxu1 %v1488_v1 }
 0x381   :  { %v234_v43 = vpop.f32.mrf.mxu1 }
 0x382   :  { %v239_v44 = vrot.slane %v234_v43, 1  ;;  %v242_v45 = vadd.f32 %v234_v43, %v159_v41 }
 0x383   :  { %v1265_v46 = vpop.f32.mrf.mxu1 }
 0x384   :  { %v243_v47 = vadd.f32 %v239_v44, %v160_v42  ;;  %1354 = vtanh.f32 %v242_v45  ;;  %v1184_v50 = vmul.f32 -1.442695, %v242_v45 }
 0x386   :  { %1356 = vtanh.f32 %v243_v47  ;;  %v1185_v51 = vmul.f32 -1.442695, %v243_v47 }
 0x387   :  { %1358 = vpow2.f32 %v1184_v50 }
 0x388   :  { %1360 = vpow2.f32 %v1185_v51 }
 0x391   :  { %v1355_v48 = vpop.eup %1354 }
 0x392   :  { %262 = vrot.lane.b32.xlu0 %v1355_v48, %s1490_s23 }
 0x393   :  { %v1357_v49 = vpop.eup %1356 }
 0x394   :  { %264 = vrot.lane.b32.xlu1 %v1357_v49, %s1490_s23  ;;  %v1359_v52 = vpop.eup %1358 }
 0x395   :  { %v1361_v53 = vpop.eup %1360  ;;  %v250_v54 = vadd.f32 1.0, %v1359_v52 }
 0x396   :  { %v251_v55 = vadd.f32 1.0, %v1361_v53 }
 0x397   :  { %1362 = vrcp.f32 %v250_v54 }
 0x398   :  { %1364 = vrcp.f32 %v251_v55 }
 0x3a4   :  { %v1363_v56 = vpop.eup %1362 }
 0x3a5   :  { %v1365_v59 = vpop.eup %1364  ;;  %v258_v62 = vmul.f32 %v1363_v56, %v134_v31 }
 0x3a6   :  { %v259_v6 = vmul.f32 %v1365_v59, %v1577_v28 }
 0x404   :  { %v263_v57 = vpop.permute.xlu0 %262 }
 0x405   :  { %v268_v58 = vmul.f32 %v1363_v56, %v263_v57  ;;  %v445_v57 = vld [vmem:[%s1876_s0 + $0xb] sm:$0x1] }
 0x406   :  { %v265_v60 = vpop.permute.xlu1 %264 }
 0x407   :  { %272 = vrot.lane.b32.xlu0 %v268_v58, %s1491_s24  ;;  %v269_v61 = vmul.f32 %v1365_v59, %v265_v60 }
 0x409   :  { %274 = vrot.lane.b32.xlu1 %v269_v61, %s1491_s24 }
 0x479   :  { %v273_v63 = vpop.permute.xlu0 %272 }
 0x47a   :  { %v278_v5 = vadd.f32 %v273_v63, %v258_v62 }
 0x47b   :  { %v275_v7 = vpop.permute.xlu1 %274 }
 0x47c   :  { %1366 = vtanh.f32 %v278_v5  ;;  %v279_v8 = vadd.f32 %v275_v7, %v259_v6 }
 0x47e   :  { %1368 = vtanh.f32 %v279_v8 }
 0x489   :  { %v1367_v9 = vpop.eup %1366 }
 0x48a   :  { %284 = vrot.lane.b32.xlu0 %v1367_v9, %s1490_s23 }
 0x48b   :  { %v1369_v10 = vpop.eup %1368 }
 0x48c   :  { %286 = vrot.lane.b32.xlu1 %v1369_v10, %s1490_s23 }
 0x4fc   :  { %v285_v11 = vpop.permute.xlu0 %284 }
 0x4fd   :  { %v1616_v14 = vmul.f32 %v1363_v56, %v285_v11  ;;  %v444_v56 = vld [vmem:[%s1876_s0 + $0x3] sm:$0x1] }
 0x4fe   :  { %v287_v12 = vpop.permute.xlu1 %286 }
 0x4ff   :  { %v1614_v13 = vmul.f32 %v1365_v59, %v287_v12 }
 0x501   :  { %v304_v15 = vrot.slane %v1614_v13, 7 }
 0x503   :  { %v305_v16 = vsel %vm162_vm1, %v304_v15, %v1616_v14 }
 0x504   :  { %306 = vrot.lane.b32.xlu1 %v305_v16, %s1491_s24 }
 0x576   :  { %v307_v17 = vpop.permute.xlu1 %306 }
 0x577   :  { %1275 = vmatmul.mubr.msk.f32.vlgmr.msra.gmra.mxu0 %vm20_vm2, %v307_v17 }
 0x578   :  { %1289 = vmatpush3.msra.mxu0 %v1517_v0  ;;  %1296 = vmatprep.mubr.msk.f32.mxu0 %vm1489_vm0, %v1488_v1 }
 0x579   :  { %1290 = vmatprep.subr.mxu0 %v1488_v1 }
 0x57a   :  { %1291 = vmatpush3.msra.mxu0 %v1523_v2 }
 0x57b   :  { %1292 = vmatprep.subr.mxu0 %v1488_v1 }
 0x57c   :  { %1293 = vmatpush3.msra.mxu0 %v1533_v3 }
 0x57d   :  { %1294 = vmatprep.subr.mxu0 %v1488_v1 }
 0x57e   :  { %1295 = vmatpush3.msra.mxu0 %v1542_v4 }
 0x57f   :  { %1310 = vmatprep.subr.mxu0 %v1488_v1 }
 0x637   :  { %v376_v20 = vpop.f32.mrf.mxu0 }
 0x638   :  { %v381_v21 = vrot.slane %v376_v20, 1  ;;  %v384_v22 = vadd.f32 %v376_v20, %v302_v18 }
 0x639   :  { %v1276_v23 = vpop.f32.mrf.mxu0 }
 0x63a   :  { %v385_v24 = vadd.f32 %v381_v21, %v303_v19  ;;  %1370 = vtanh.f32 %v384_v22  ;;  %v1187_v27 = vmul.f32 -1.442695, %v384_v22 }
 0x63c   :  { %1372 = vtanh.f32 %v385_v24  ;;  %v1188_v28 = vmul.f32 -1.442695, %v385_v24 }
 0x63d   :  { %1374 = vpow2.f32 %v1187_v27 }
 0x63e   :  { %1376 = vpow2.f32 %v1188_v28 }
 0x647   :  { %v1371_v25 = vpop.eup %1370 }
 0x648   :  { %404 = vrot.lane.b32.xlu1 %v1371_v25, %s1490_s23 }
 0x649   :  { %v1373_v26 = vpop.eup %1372 }
 0x64a   :  { %406 = vrot.lane.b32.xlu0 %v1373_v26, %s1490_s23  ;;  %v1375_v29 = vpop.eup %1374 }
 0x64b   :  { %v1377_v30 = vpop.eup %1376  ;;  %v392_v31 = vadd.f32 1.0, %v1375_v29 }
 0x64c   :  { %v393_v32 = vadd.f32 1.0, %v1377_v30 }
 0x64d   :  { %1378 = vrcp.f32 %v392_v31 }
 0x64e   :  { %1380 = vrcp.f32 %v393_v32 }
 0x65a   :  { %v1379_v33 = vpop.eup %1378 }
 0x65b   :  { %v1381_v37 = vpop.eup %1380  ;;  %v400_v41 = vmul.f32 %v1379_v33, %v278_v5 }
 0x65c   :  { %v401_v44 = vmul.f32 %v1381_v37, %v279_v8 }
 0x6ba   :  { %v405_v34 = vpop.permute.xlu1 %404 }
 0x6bb   :  { %v410_v36 = vmul.f32 %v1379_v33, %v405_v34 }
 0x6bc   :  { %v407_v39 = vpop.permute.xlu0 %406 }
 0x6bd   :  { %414 = vrot.lane.b32.xlu1 %v410_v36, %s1491_s24  ;;  %v411_v40 = vmul.f32 %v1381_v37, %v407_v39  ;;  %v586_v36 = vld [vmem:[%s1876_s0 + $0x4] sm:$0x1] }
 0x6bf   :  { %416 = vrot.lane.b32.xlu0 %v411_v40, %s1491_s24 }
 0x72f   :  { %v415_v42 = vpop.permute.xlu1 %414 }
 0x730   :  { %v420_v43 = vadd.f32 %v415_v42, %v400_v41 }
 0x731   :  { %v417_v45 = vpop.permute.xlu0 %416 }
 0x732   :  { %1382 = vtanh.f32 %v420_v43  ;;  %v421_v46 = vadd.f32 %v417_v45, %v401_v44 }
 0x734   :  { %1384 = vtanh.f32 %v421_v46 }
 0x73f   :  { %v1383_v47 = vpop.eup %1382 }
 0x740   :  { %426 = vrot.lane.b32.xlu1 %v1383_v47, %s1490_s23 }
 0x741   :  { %v1385_v48 = vpop.eup %1384 }
 0x742   :  { %428 = vrot.lane.b32.xlu0 %v1385_v48, %s1490_s23 }
 0x7b2   :  { %v427_v49 = vpop.permute.xlu1 %426 }
 0x7b3   :  { %v1647_v52 = vmul.f32 %v1379_v33, %v427_v49 }
 0x7b4   :  { %v429_v50 = vpop.permute.xlu0 %428 }
 0x7b5   :  { %v1645_v51 = vmul.f32 %v1381_v37, %v429_v50  ;;  %v587_v37 = vld [vmem:[%s1876_s0 + $0xc] sm:$0x1] }
 0x7b7   :  { %v446_v53 = vrot.slane %v1645_v51, 7 }
 0x7b9   :  { %v447_v54 = vsel %vm162_vm1, %v446_v53, %v1647_v52 }
 0x7ba   :  { %448 = vrot.lane.b32.xlu0 %v447_v54, %s1491_s24 }
 0x82c   :  { %v449_v55 = vpop.permute.xlu0 %448 }
 0x82d   :  { %1286 = vmatmul.mubr.msk.f32.vlgmr.msra.gmra.mxu1 %vm20_vm2, %v449_v55 }
 0x82e   :  { %1300 = vmatpush3.msra.mxu1 %v1517_v0  ;;  %1307 = vmatprep.mubr.msk.f32.mxu1 %vm1489_vm0, %v1488_v1 }
 0x82f   :  { %1301 = vmatprep.subr.mxu1 %v1488_v1 }
 0x830   :  { %1302 = vmatpush3.msra.mxu1 %v1523_v2 }
 0x831   :  { %1303 = vmatprep.subr.mxu1 %v1488_v1 }
 0x832   :  { %1304 = vmatpush3.msra.mxu1 %v1533_v3 }
 0x833   :  { %1305 = vmatprep.subr.mxu1 %v1488_v1 }
 0x834   :  { %1306 = vmatpush3.msra.mxu1 %v1542_v4 }
 0x835   :  { %1321 = vmatprep.subr.mxu1 %v1488_v1 }
 0x8ed   :  { %v518_v58 = vpop.f32.mrf.mxu1 }
 0x8ee   :  { %v523_v59 = vrot.slane %v518_v58, 1  ;;  %v526_v60 = vadd.f32 %v518_v58, %v444_v56 }
 0x8ef   :  { %v1287_v61 = vpop.f32.mrf.mxu1 }
 0x8f0   :  { %v527_v62 = vadd.f32 %v523_v59, %v445_v57  ;;  %1386 = vtanh.f32 %v526_v60  ;;  %v1190_v6 = vmul.f32 -1.442695, %v526_v60 }
 0x8f2   :  { %1388 = vtanh.f32 %v527_v62  ;;  %v1191_v7 = vmul.f32 -1.442695, %v527_v62 }
 0x8f3   :  { %1390 = vpow2.f32 %v1190_v6 }
 0x8f4   :  { %1392 = vpow2.f32 %v1191_v7 }
 0x8fd   :  { %v1387_v63 = vpop.eup %1386 }
 0x8fe   :  { %546 = vrot.lane.b32.xlu0 %v1387_v63, %s1490_s23 }
 0x8ff   :  { %v1389_v5 = vpop.eup %1388 }
 0x900   :  { %548 = vrot.lane.b32.xlu1 %v1389_v5, %s1490_s23  ;;  %v1391_v8 = vpop.eup %1390 }
 0x901   :  { %v1393_v9 = vpop.eup %1392  ;;  %v534_v10 = vadd.f32 1.0, %v1391_v8 }
 0x902   :  { %v535_v11 = vadd.f32 1.0, %v1393_v9 }
 0x903   :  { %1394 = vrcp.f32 %v534_v10 }
 0x904   :  { %1396 = vrcp.f32 %v535_v11 }
 0x910   :  { %v1395_v12 = vpop.eup %1394 }
 0x911   :  { %v1397_v17 = vpop.eup %1396  ;;  %v542_v20 = vmul.f32 %v1395_v12, %v420_v43 }
 0x912   :  { %v543_v23 = vmul.f32 %v1397_v17, %v421_v46 }
 0x970   :  { %v547_v15 = vpop.permute.xlu0 %546 }
 0x971   :  { %v552_v16 = vmul.f32 %v1395_v12, %v547_v15 }
 0x972   :  { %v549_v18 = vpop.permute.xlu1 %548 }
 0x973   :  { %556 = vrot.lane.b32.xlu0 %v552_v16, %s1491_s24  ;;  %v553_v19 = vmul.f32 %v1397_v17, %v549_v18  ;;  %v728_v18 = vld [vmem:[%s1876_s0 + $0x5] sm:$0x1] }
 0x975   :  { %558 = vrot.lane.b32.xlu1 %v553_v19, %s1491_s24 }
 0x9e5   :  { %v557_v21 = vpop.permute.xlu0 %556 }
 0x9e6   :  { %v562_v22 = vadd.f32 %v557_v21, %v542_v20 }
 0x9e7   :  { %v559_v24 = vpop.permute.xlu1 %558 }
 0x9e8   :  { %1398 = vtanh.f32 %v562_v22  ;;  %v563_v25 = vadd.f32 %v559_v24, %v543_v23 }
 0x9ea   :  { %1400 = vtanh.f32 %v563_v25 }
 0x9f5   :  { %v1399_v26 = vpop.eup %1398 }
 0x9f6   :  { %568 = vrot.lane.b32.xlu0 %v1399_v26, %s1490_s23 }
 0x9f7   :  { %v1401_v27 = vpop.eup %1400 }
 0x9f8   :  { %570 = vrot.lane.b32.xlu1 %v1401_v27, %s1490_s23 }
 0xa68   :  { %v569_v28 = vpop.permute.xlu0 %568 }
 0xa69   :  { %v1678_v31 = vmul.f32 %v1395_v12, %v569_v28 }
 0xa6a   :  { %v571_v29 = vpop.permute.xlu1 %570 }
 0xa6b   :  { %v1676_v30 = vmul.f32 %v1397_v17, %v571_v29 }
 0xa6d   :  { %v588_v32 = vrot.slane %v1676_v30, 7 }
 0xa6f   :  { %v589_v33 = vsel %vm162_vm1, %v588_v32, %v1678_v31 }
 0xa70   :  { %590 = vrot.lane.b32.xlu1 %v589_v33, %s1491_s24 }
 0xae2   :  { %v591_v34 = vpop.permute.xlu1 %590 }
 0xae3   :  { %1297 = vmatmul.mubr.msk.f32.vlgmr.msra.gmra.mxu0 %vm20_vm2, %v591_v34 }
 0xae4   :  { %1311 = vmatpush3.msra.mxu0 %v1517_v0  ;;  %1318 = vmatprep.mubr.msk.f32.mxu0 %vm1489_vm0, %v1488_v1 }
 0xae5   :  { %1312 = vmatprep.subr.mxu0 %v1488_v1 }
 0xae6   :  { %1313 = vmatpush3.msra.mxu0 %v1523_v2 }
 0xae7   :  { %1314 = vmatprep.subr.mxu0 %v1488_v1 }
 0xae8   :  { %1315 = vmatpush3.msra.mxu0 %v1533_v3 }
 0xae9   :  { %1316 = vmatprep.subr.mxu0 %v1488_v1 }
 0xaea   :  { %1317 = vmatpush3.msra.mxu0 %v1542_v4 }
 0xba3   :  { %v660_v39 = vpop.f32.mrf.mxu0 }
 0xba4   :  { %v665_v40 = vrot.slane %v660_v39, 1  ;;  %v668_v41 = vadd.f32 %v660_v39, %v586_v36 }
 0xba5   :  { %v1298_v42 = vpop.f32.mrf.mxu0 }
 0xba6   :  { %v669_v43 = vadd.f32 %v665_v40, %v587_v37  ;;  %1402 = vtanh.f32 %v668_v41  ;;  %v1193_v46 = vmul.f32 -1.442695, %v668_v41 }
 0xba8   :  { %1404 = vtanh.f32 %v669_v43  ;;  %v1194_v47 = vmul.f32 -1.442695, %v669_v43 }
 0xba9   :  { %1406 = vpow2.f32 %v1193_v46 }
 0xbaa   :  { %1408 = vpow2.f32 %v1194_v47 }
 0xbb3   :  { %v1403_v44 = vpop.eup %1402 }
 0xbb4   :  { %688 = vrot.lane.b32.xlu1 %v1403_v44, %s1490_s23 }
 0xbb5   :  { %v1405_v45 = vpop.eup %1404 }
 0xbb6   :  { %690 = vrot.lane.b32.xlu0 %v1405_v45, %s1490_s23  ;;  %v1407_v48 = vpop.eup %1406 }
 0xbb7   :  { %v1409_v49 = vpop.eup %1408  ;;  %v676_v50 = vadd.f32 1.0, %v1407_v48 }
 0xbb8   :  { %v677_v53 = vadd.f32 1.0, %v1409_v49 }
 0xbb9   :  { %1410 = vrcp.f32 %v676_v50 }
 0xbba   :  { %1412 = vrcp.f32 %v677_v53 }
 0xbc6   :  { %v1411_v54 = vpop.eup %1410 }
 0xbc7   :  { %v1413_v57 = vpop.eup %1412  ;;  %v684_v60 = vmul.f32 %v1411_v54, %v562_v22 }
 0xbc8   :  { %v685_v63 = vmul.f32 %v1413_v57, %v563_v25 }
 0xc26   :  { %v689_v55 = vpop.permute.xlu1 %688 }
 0xc27   :  { %v694_v56 = vmul.f32 %v1411_v54, %v689_v55  ;;  %v870_v55 = vld [vmem:[%s1876_s0 + $0x6] sm:$0x1] }
 0xc28   :  { %v691_v58 = vpop.permute.xlu0 %690 }
 0xc29   :  { %698 = vrot.lane.b32.xlu1 %v694_v56, %s1491_s24  ;;  %v695_v59 = vmul.f32 %v1413_v57, %v691_v58  ;;  %v871_v56 = vld [vmem:[%s1876_s0 + $0xe] sm:$0x1] }
 0xc2b   :  { %700 = vrot.lane.b32.xlu0 %v695_v59, %s1491_s24 }
 0xc9b   :  { %v699_v61 = vpop.permute.xlu1 %698 }
 0xc9c   :  { %v704_v62 = vadd.f32 %v699_v61, %v684_v60 }
 0xc9d   :  { %v701_v5 = vpop.permute.xlu0 %700 }
 0xc9e   :  { %1414 = vtanh.f32 %v704_v62  ;;  %v705_v6 = vadd.f32 %v701_v5, %v685_v63 }
 0xca0   :  { %1416 = vtanh.f32 %v705_v6 }
 0xcab   :  { %v1415_v7 = vpop.eup %1414 }
 0xcac   :  { %710 = vrot.lane.b32.xlu1 %v1415_v7, %s1490_s23 }
 0xcad   :  { %v1417_v8 = vpop.eup %1416 }
 0xcae   :  { %712 = vrot.lane.b32.xlu0 %v1417_v8, %s1490_s23 }
 0xd1e   :  { %v711_v9 = vpop.permute.xlu1 %710 }
 0xd1f   :  { %v1708_v12 = vmul.f32 %v1411_v54, %v711_v9 }
 0xd20   :  { %v713_v10 = vpop.permute.xlu0 %712 }
 0xd21   :  { %v1706_v11 = vmul.f32 %v1413_v57, %v713_v10 }
 0xd23   :  { %v730_v15 = vrot.slane %v1706_v11, 7 }
 0xd25   :  { %v731_v16 = vsel %vm162_vm1, %v730_v15, %v1708_v12 }
 0xd26   :  { %732 = vrot.lane.b32.xlu0 %v731_v16, %s1491_s24 }
 0xd98   :  { %v733_v17 = vpop.permute.xlu0 %732 }
 0xd99   :  { %1308 = vmatmul.mubr.msk.f32.vlgmr.msra.gmra.mxu1 %vm20_vm2, %v733_v17 }
 0xd9a   :  { %1322 = vmatpush3.msra.mxu1 %v1517_v0  ;;  %1329 = vmatprep.mubr.msk.f32.mxu1 %vm1489_vm0, %v1488_v1  ;;  %v729_v0 = vld [vmem:[%s1876_s0 + $0xd] sm:$0x1] }
 0xd9b   :  { %1323 = vmatprep.subr.mxu1 %v1488_v1 }
 0xd9c   :  { %1324 = vmatpush3.msra.mxu1 %v1523_v2 }
 0xd9d   :  { %1325 = vmatprep.subr.mxu1 %v1488_v1 }
 0xd9e   :  { %1326 = vmatpush3.msra.mxu1 %v1533_v3 }
 0xd9f   :  { %1327 = vmatprep.subr.mxu1 %v1488_v1 }
 0xda0   :  { %1328 = vmatpush3.msra.mxu1 %v1542_v4 }
 0xe59   :  { %v802_v19 = vpop.f32.mrf.mxu1 }
 0xe5a   :  { %v807_v20 = vrot.slane %v802_v19, 1  ;;  %v810_v21 = vadd.f32 %v802_v19, %v728_v18 }
 0xe5b   :  { %v1309_v2 = vpop.f32.mrf.mxu1 }
 0xe5c   :  { %v811_v22 = vadd.f32 %v807_v20, %v729_v0  ;;  %1418 = vtanh.f32 %v810_v21  ;;  %v1196_v4 = vmul.f32 -1.442695, %v810_v21 }
 0xe5e   :  { %1420 = vtanh.f32 %v811_v22  ;;  %v1197_v23 = vmul.f32 -1.442695, %v811_v22 }
 0xe5f   :  { %1422 = vpow2.f32 %v1196_v4 }
 0xe60   :  { %1424 = vpow2.f32 %v1197_v23 }
 0xe69   :  { %v1419_v3 = vpop.eup %1418 }
 0xe6a   :  { %830 = vrot.lane.b32.xlu0 %v1419_v3, %s1490_s23 }
 0xe6b   :  { %v1421_v1 = vpop.eup %1420 }
 0xe6c   :  { %832 = vrot.lane.b32.xlu1 %v1421_v1, %s1490_s23  ;;  %v1423_v24 = vpop.eup %1422 }
 0xe6d   :  { %v1425_v25 = vpop.eup %1424  ;;  %v818_v26 = vadd.f32 1.0, %v1423_v24 }
 0xe6e   :  { %v819_v27 = vadd.f32 1.0, %v1425_v25 }
 0xe6f   :  { %1426 = vrcp.f32 %v818_v26 }
 0xe70   :  { %1428 = vrcp.f32 %v819_v27 }
 0xe7c   :  { %v1427_v28 = vpop.eup %1426 }
 0xe7d   :  { %v1429_v33 = vpop.eup %1428  ;;  %v826_v37 = vmul.f32 %v1427_v28, %v704_v62 }
 0xe7e   :  { %v827_v41 = vmul.f32 %v1429_v33, %v705_v6 }
 0xedc   :  { %v831_v29 = vpop.permute.xlu0 %830 }
 0xedd   :  { %v836_v32 = vmul.f32 %v1427_v28, %v831_v29 }
 0xede   :  { %v833_v34 = vpop.permute.xlu1 %832 }
 0xedf   :  { %840 = vrot.lane.b32.xlu0 %v836_v32, %s1491_s24  ;;  %v837_v36 = vmul.f32 %v1429_v33, %v833_v34  ;;  %v1013_v34 = vld [vmem:[%s1876_s0 + $0xf] sm:$0x1] }
 0xee1   :  { %842 = vrot.lane.b32.xlu1 %v837_v36, %s1491_s24 }
 0xf51   :  { %v841_v39 = vpop.permute.xlu0 %840 }
 0xf52   :  { %v846_v40 = vadd.f32 %v841_v39, %v826_v37 }
 0xf53   :  { %v843_v42 = vpop.permute.xlu1 %842 }
 0xf54   :  { %1430 = vtanh.f32 %v846_v40  ;;  %v847_v43 = vadd.f32 %v843_v42, %v827_v41 }
 0xf56   :  { %1432 = vtanh.f32 %v847_v43 }
 0xf61   :  { %v1431_v44 = vpop.eup %1430 }
 0xf62   :  { %852 = vrot.lane.b32.xlu0 %v1431_v44, %s1490_s23 }
 0xf63   :  { %v1433_v45 = vpop.eup %1432 }
 0xf64   :  { %854 = vrot.lane.b32.xlu1 %v1433_v45, %s1490_s23 }
 0xfd4   :  { %v853_v46 = vpop.permute.xlu0 %852 }
 0xfd5   :  { %v1738_v49 = vmul.f32 %v1427_v28, %v853_v46 }
 0xfd6   :  { %v855_v47 = vpop.permute.xlu1 %854 }
 0xfd7   :  { %v1736_v48 = vmul.f32 %v1429_v33, %v855_v47  ;;  %v1012_v33 = vld [vmem:[%s1876_s0 + $0x7] sm:$0x1]  ;;  %s1492_s0 = smov 96  }
 0xfd9   :  { %v872_v50 = vrot.slane %v1736_v48, 7 }
 0xfdb   :  { %v873_v53 = vsel %vm162_vm1, %v872_v50, %v1738_v49 }
 0xfdc   :  { %874 = vrot.lane.b32.xlu1 %v873_v53, %s1491_s24 }
0x104e   :  { %v875_v54 = vpop.permute.xlu1 %874 }
0x104f   :  { %1319 = vmatmul.mubr.msk.f32.vlgmr.msra.gmra.mxu0 %vm20_vm2, %v875_v54 }
0x110f   :  { %v944_v57 = vpop.f32.mrf.mxu0 }
0x1110   :  { %v949_v58 = vrot.slane %v944_v57, 1  ;;  %v952_v59 = vadd.f32 %v944_v57, %v870_v55 }
0x1111   :  { %v1320_v60 = vpop.f32.mrf.mxu0 }
0x1112   :  { %v953_v61 = vadd.f32 %v949_v58, %v871_v56  ;;  %1434 = vtanh.f32 %v952_v59  ;;  %v1199_v5 = vmul.f32 -1.442695, %v952_v59 }
0x1114   :  { %1436 = vtanh.f32 %v953_v61  ;;  %v1200_v6 = vmul.f32 -1.442695, %v953_v61 }
0x1115   :  { %1438 = vpow2.f32 %v1199_v5 }
0x1116   :  { %1440 = vpow2.f32 %v1200_v6 }
0x111f   :  { %v1435_v62 = vpop.eup %1434 }
0x1120   :  { %972 = vrot.lane.b32.xlu1 %v1435_v62, %s1490_s23 }
0x1121   :  { %v1437_v63 = vpop.eup %1436 }
0x1122   :  { %974 = vrot.lane.b32.xlu0 %v1437_v63, %s1490_s23  ;;  %v1439_v7 = vpop.eup %1438 }
0x1123   :  { %v1441_v8 = vpop.eup %1440  ;;  %v960_v9 = vadd.f32 1.0, %v1439_v7 }
0x1124   :  { %v961_v10 = vadd.f32 1.0, %v1441_v8 }
0x1125   :  { %1442 = vrcp.f32 %v960_v9 }
0x1126   :  { %1444 = vrcp.f32 %v961_v10 }
0x1132   :  { %v1443_v15 = vpop.eup %1442 }
0x1133   :  { %v1445_v18 = vpop.eup %1444  ;;  %v968_v20 = vmul.f32 %v1443_v15, %v846_v40 }
0x1134   :  { %v969_v22 = vmul.f32 %v1445_v18, %v847_v43 }
0x1192   :  { %v973_v16 = vpop.permute.xlu1 %972 }
0x1193   :  { %v978_v17 = vmul.f32 %v1443_v15, %v973_v16 }
0x1194   :  { %v975_v0 = vpop.permute.xlu0 %974 }
0x1195   :  { %982 = vrot.lane.b32.xlu1 %v978_v17, %s1491_s24  ;;  %v979_v19 = vmul.f32 %v1445_v18, %v975_v0 }
0x1197   :  { %984 = vrot.lane.b32.xlu0 %v979_v19, %s1491_s24 }
0x1207   :  { %v983_v21 = vpop.permute.xlu1 %982 }
0x1208   :  { %v988_v2 = vadd.f32 %v983_v21, %v968_v20 }
0x1209   :  { %v985_v3 = vpop.permute.xlu0 %984 }
0x120a   :  { %1446 = vtanh.f32 %v988_v2  ;;  %v989_v1 = vadd.f32 %v985_v3, %v969_v22 }
0x120c   :  { %1448 = vtanh.f32 %v989_v1 }
0x1217   :  { %v1447_v4 = vpop.eup %1446 }
0x1218   :  { %994 = vrot.lane.b32.xlu1 %v1447_v4, %s1490_s23 }
0x1219   :  { %v1449_v23 = vpop.eup %1448 }
0x121a   :  { %996 = vrot.lane.b32.xlu0 %v1449_v23, %s1490_s23 }
0x128a   :  { %v995_v24 = vpop.permute.xlu1 %994 }
0x128b   :  { %v1759_v27 = vmul.f32 %v1443_v15, %v995_v24 }
0x128c   :  { %v997_v25 = vpop.permute.xlu0 %996 }
0x128d   :  { %v1757_v26 = vmul.f32 %v1445_v18, %v997_v25 }
0x128f   :  { %v1014_v28 = vrot.slane %v1757_v26, 7 }
0x1291   :  { %v1015_v29 = vsel %vm162_vm1, %v1014_v28, %v1759_v27 }
0x1292   :  { %1016 = vrot.lane.b32.xlu0 %v1015_v29, %s1491_s24 }
0x1304   :  { %v1017_v32 = vpop.permute.xlu0 %1016 }
0x1305   :  { %1330 = vmatmul.mubr.msk.f32.vlgmr.msra.gmra.mxu1 %vm20_vm2, %v1017_v32 }
0x13c5   :  { %v1086_v36 = vpop.f32.mrf.mxu1 }
0x13c6   :  { %v1091_v37 = vrot.slane %v1086_v36, 1  ;;  %v1094_v39 = vadd.f32 %v1086_v36, %v1012_v33 }
0x13c7   :  { %v1331_v40 = vpop.f32.mrf.mxu1 }
0x13c8   :  { %v1095_v41 = vadd.f32 %v1091_v37, %v1013_v34  ;;  %1450 = vtanh.f32 %v1094_v39  ;;  %v1202_v44 = vmul.f32 -1.442695, %v1094_v39 }
0x13ca   :  { %1452 = vtanh.f32 %v1095_v41  ;;  %v1203_v45 = vmul.f32 -1.442695, %v1095_v41 }
0x13cb   :  { %1454 = vpow2.f32 %v1202_v44 }
0x13cc   :  { %1456 = vpow2.f32 %v1203_v45 }
0x13d5   :  { %v1451_v42 = vpop.eup %1450 }
0x13d6   :  { %1114 = vrot.lane.b32.xlu1 %v1451_v42, %s1490_s23 }
0x13d7   :  { %v1453_v43 = vpop.eup %1452 }
0x13d8   :  { %1116 = vrot.lane.b32.xlu0 %v1453_v43, %s1490_s23  ;;  %v1455_v46 = vpop.eup %1454 }
0x13d9   :  { %v1457_v47 = vpop.eup %1456  ;;  %v1102_v50 = vadd.f32 1.0, %v1455_v46 }
0x13da   :  { %v1103_v53 = vadd.f32 1.0, %v1457_v47 }
0x13db   :  { %1458 = vrcp.f32 %v1102_v50 }
0x13dc   :  { %1460 = vrcp.f32 %v1103_v53 }
0x13e8   :  { %v1459_v54 = vpop.eup %1458 }
0x13e9   :  { %v1461_v57 = vpop.eup %1460  ;;  %v1110_v60 = vmul.f32 %v1459_v54, %v988_v2 }
0x13ea   :  { %v1111_v63 = vmul.f32 %v1461_v57, %v989_v1 }
0x1448   :  { %v1115_v55 = vpop.permute.xlu1 %1114 }
0x1449   :  { %v1120_v56 = vmul.f32 %v1459_v54, %v1115_v55 }
0x144a   :  { %v1117_v58 = vpop.permute.xlu0 %1116 }
0x144b   :  { %1124 = vrot.lane.b32.xlu1 %v1120_v56, %s1491_s24  ;;  %v1121_v59 = vmul.f32 %v1461_v57, %v1117_v58 }
0x144d   :  { %1126 = vrot.lane.b32.xlu0 %v1121_v59, %s1491_s24 }
0x14bd   :  { %v1125_v61 = vpop.permute.xlu1 %1124 }
0x14be   :  { %v1130_v62 = vadd.f32 %v1125_v61, %v1110_v60 }
0x14bf   :  { %v1127_v5 = vpop.permute.xlu0 %1126 }
0x14c0   :  { %1462 = vtanh.f32 %v1130_v62  ;;  %v1131_v6 = vadd.f32 %v1127_v5, %v1111_v63 }
0x14c2   :  { %1464 = vtanh.f32 %v1131_v6  ;;  %v1156_v8 = vrot.slane %v1131_v6, 7 }
0x14c4   :  { %v1157_v10 = vsel %vm162_vm1, %v1156_v8, %v1130_v62 }
0x14cd   :  { %v1463_v7 = vpop.eup %1462 }
0x14ce   :  { %1136 = vrot.lane.b32.xlu1 %v1463_v7, %s1490_s23 }
0x14cf   :  { %v1465_v9 = vpop.eup %1464 }
0x14d0   :  { %1138 = vrot.lane.b32.xlu0 %v1465_v9, %s1490_s23  ;;  %s1493_s23 = smov [#allocation2]  }
0x14d1   :  { %s1171_s27 = sshll.u32 %s1493_s23, 4  ;;  %s1172_s27 = int_to_ptr.vmem [resolvable:$true] %s1171_s27 }
0x14d2   :  { %1158 = vrot.lane.b32.xlu1 %v1157_v10, %s1492_s0  ;;  %s1466_s28 = scalar_lea.vmem %s1172_s27, 32  ;;  %p1471_p1 = scmp.lt.s32.totalorder %s1172_s27, %s1172_s27 }
0x14d3   :  { %p1467_p0 = scmp.ne.s32.totalorder %s1172_s27, %s1466_s28  ;;  %p1472_p2 = scmp.lt.s32.totalorder %s1466_s28, %s1466_s28 }
0x14d4   :  { %150 = vrot.lane.b32.xlu0 %v1585_v38, %s1491_s24 }
0x14d5   :  { %p1473_p3 = por %p1472_p2, %p1471_p1 }
0x14d6   :  { %152 = vrot.lane.b32.xlu1 %v1582_v35, %s1491_s24 }
0x14d7   :  { %p1474_p4 = pnand %p1473_p3, %p1467_p0 }
0x14d8   :  { %294 = vrot.lane.b32.xlu0 %v1616_v14, %s1491_s24 }
0x14da   :  { %296 = vrot.lane.b32.xlu1 %v1614_v13, %s1491_s24 }
0x14dc   :  { %436 = vrot.lane.b32.xlu0 %v1647_v52, %s1491_s24 }
0x14de   :  { %438 = vrot.lane.b32.xlu1 %v1645_v51, %s1491_s24 }
0x14e0   :  { %578 = vrot.lane.b32.xlu0 %v1678_v31, %s1491_s24 }
0x14e2   :  { %580 = vrot.lane.b32.xlu1 %v1676_v30, %s1491_s24 }
0x14e4   :  { %720 = vrot.lane.b32.xlu0 %v1708_v12, %s1491_s24 }
0x14e6   :  { %722 = vrot.lane.b32.xlu1 %v1706_v11, %s1491_s24 }
0x14e8   :  { %862 = vrot.lane.b32.xlu0 %v1738_v49, %s1491_s24 }
0x14ea   :  { %864 = vrot.lane.b32.xlu1 %v1736_v48, %s1491_s24 }
0x14ec   :  { %1004 = vrot.lane.b32.xlu0 %v1759_v27, %s1491_s24 }
0x14ee   :  { %1006 = vrot.lane.b32.xlu1 %v1757_v26, %s1491_s24 }
0x1540   :  { %v1137_v35 = vpop.permute.xlu1 %1136 }
0x1541   :  { %v1142_v38 = vmul.f32 %v1459_v54, %v1137_v35 }
0x1542   :  { %v1139_v13 = vpop.permute.xlu0 %1138 }
0x1543   :  { %1146 = vrot.lane.b32.xlu0 %v1142_v38, %s1491_s24  ;;  %v1143_v14 = vmul.f32 %v1461_v57, %v1139_v13 }
0x1544   :  { %v1159_v51 = vpop.permute.xlu1 %1158 }
0x1545   :  { %1162 = vst.msk [vmem:[#allocation2] sm:$0x3] %vm1161_vm3, %v1159_v51  ;;  %1148 = vrot.lane.b32.xlu1 %v1143_v14, %s1491_s24 }
0x1546   :  { %1477 = shalt.err (!%p1474_p4)
}
0x1547   :  { %1174 = dma.vmem_to_hbm [thread:$0]  %s1172_s27, 32, %s1879_s3, [#allocation3]   ;;  %v151_v52 = vpop.permute.xlu0 %150 }
0x1548   :  { %157 = vst.msk [vmem:[%s1878_s2] sm:$0x1] %vm156_vm4, %v151_v52  ;;  %v153_v30 = vpop.permute.xlu1 %152 }
0x1549   :  { %158 = vst.msk [vmem:[%s1878_s2 + $0x8] sm:$0x1] %vm156_vm4, %v153_v30 }
0x154b   :  { %v295_v31 = vpop.permute.xlu0 %294 }
0x154c   :  { %300 = vst.msk [vmem:[%s1878_s2 + $0x1] sm:$0x1] %vm156_vm4, %v295_v31  ;;  %v297_v11 = vpop.permute.xlu1 %296 }
0x154d   :  { %301 = vst.msk [vmem:[%s1878_s2 + $0x9] sm:$0x1] %vm156_vm4, %v297_v11 }
0x154f   :  { %v437_v12 = vpop.permute.xlu0 %436 }
0x1550   :  { %442 = vst.msk [vmem:[%s1878_s2 + $0x2] sm:$0x1] %vm156_vm4, %v437_v12  ;;  %v439_v48 = vpop.permute.xlu1 %438 }
0x1551   :  { %443 = vst.msk [vmem:[%s1878_s2 + $0xa] sm:$0x1] %vm156_vm4, %v439_v48 }
0x1553   :  { %v579_v49 = vpop.permute.xlu0 %578 }
0x1554   :  { %584 = vst.msk [vmem:[%s1878_s2 + $0x3] sm:$0x1] %vm156_vm4, %v579_v49  ;;  %v581_v15 = vpop.permute.xlu1 %580 }
0x1555   :  { %585 = vst.msk [vmem:[%s1878_s2 + $0xb] sm:$0x1] %vm156_vm4, %v581_v15 }
0x1557   :  { %v721_v16 = vpop.permute.xlu0 %720 }
0x1558   :  { %726 = vst.msk [vmem:[%s1878_s2 + $0x4] sm:$0x1] %vm156_vm4, %v721_v16  ;;  %v723_v17 = vpop.permute.xlu1 %722 }
0x1559   :  { %727 = vst.msk [vmem:[%s1878_s2 + $0xc] sm:$0x1] %vm156_vm4, %v723_v17 }
0x155b   :  { %v863_v18 = vpop.permute.xlu0 %862 }
0x155c   :  { %868 = vst.msk [vmem:[%s1878_s2 + $0x5] sm:$0x1] %vm156_vm4, %v863_v18  ;;  %v865_v0 = vpop.permute.xlu1 %864 }
0x155d   :  { %869 = vst.msk [vmem:[%s1878_s2 + $0xd] sm:$0x1] %vm156_vm4, %v865_v0 }
0x155f   :  { %v1005_v19 = vpop.permute.xlu0 %1004 }
0x1560   :  { %1010 = vst.msk [vmem:[%s1878_s2 + $0x6] sm:$0x1] %vm156_vm4, %v1005_v19  ;;  %v1007_v20 = vpop.permute.xlu1 %1006 }
0x1561   :  { %1011 = vst.msk [vmem:[%s1878_s2 + $0xe] sm:$0x1] %vm156_vm4, %v1007_v20 }
0x15b5   :  { %v1147_v21 = vpop.permute.xlu0 %1146 }
0x15b6   :  { %1152 = vst.msk [vmem:[%s1878_s2 + $0x7] sm:$0x1] %vm156_vm4, %v1147_v21 }
0x15b7   :  { %v1149_v2 = vpop.permute.xlu1 %1148 }
0x15b8   :  { %1153 = vst.msk [vmem:[%s1878_s2 + $0xf] sm:$0x1] %vm156_vm4, %v1149_v2 }
0x15b9   :  { %1486 = dma.done.wait [#allocation3], 32  }
0x15ba   :  { %1487 = vsyncadd [#allocation3], 4294967264 }
0x15bb   :  { %1180 = vsyncpa [#allocation3], 1 }

// kernel: af_lstm_forward.2
= control target key start
LH: loop header
LB: loop body
LE: loop exit
PB: predicated region body
PF: predicated region fallthrough
CT: control target
= control target key end

     0   :  { %vm64_vm0 = vcmask 1043456   ;;  %vm57_vm1 = vcmask 31744   ;;  %vm154_vm2 = vcmask 261120   ;;  %v989_v16 = vmov 0.0   ;;  %s1167_s1 = inlined_call_operand.vmem [shape: f32[4,32], index: 1, kind: input, shape index: {}]   ;;  %s1168_s0 = inlined_call_operand.vmem [shape: f32[2,8,4], index: 0, kind: input, shape index: {}]   ;;  %s1169_s3 = inlined_call_operand.vmem [shape: f32[32,96], index: 3, kind: input, shape index: {}]   ;;  %s1170_s2 = inlined_call_operand.vmem [shape: f32[1,32], index: 2, kind: input, shape index: {}]   ;;  %s1171_s4 = inlined_call_operand.vmem [shape: f32[1,96], index: 4, kind: input, shape index: {}]   ;;  %s1172_s5 = inlined_call_operand.vmem [shape: f32[8,8], index: 5, kind: input, shape index: {}]   ;;  %s1173_s6 = inlined_call_operand.vmem [shape: f32[32,32], index: 6, kind: input, shape index: {}]   ;;  %s1174_s7 = inlined_call_operand.vmem [shape: f32[1,32], index: 7, kind: input, shape index: {}]   ;;  %s1175_s8 = inlined_call_operand.vmem [shape: f32[1,32], index: 8, kind: input, shape index: {}]   ;;  %s1176_s9 = inlined_call_operand.vmem [shape: f32[1,32], index: 9, kind: input, shape index: {}]   ;;  %s1177_s12 = inlined_call_operand.vmem [shape: f32[32,128], index: 12, kind: input, shape index: {}]   ;;  %s1178_s10 = inlined_call_operand.vmem [shape: f32[1,32], index: 10, kind: input, shape index: {}]   ;;  %s1179_s11 = inlined_call_operand.vmem [shape: f32[1,32], index: 11, kind: input, shape index: {}]   ;;  %s1180_s13 = inlined_call_operand.vmem [shape: f32[1,128], index: 13, kind: input, shape index: {}]   ;;  %s1181_s14 = inlined_call_operand.vmem [shape: f32[2,8,128], index: 14, kind: output, shape index: {}]  }
   0x1   :  { %v49_v0 = vld [vmem:[%s1167_s1] sm:$0xf]  ;;  %v48_v2 = vld [vmem:[%s1168_s0 + $0x8] sm:$0xff]  ;;  %v146_v3 = vld [vmem:[%s1169_s3 + $0x18] sm:$0xff]  ;;  %vm991_vm3 = vmmov 0   ;;  %vm255_vm4 = vcmask 64512  }
   0x2   :  { %v47_v1 = vld [vmem:[%s1168_s0] sm:$0xff]  ;;  %904 = vmatprep.subr.msk.mxu0 %vm64_vm0, %v49_v0  ;;  %909 = vmatprep.subr.mxu1 %v146_v3  ;;  %v145_v4 = vld [vmem:[%s1169_s3 + $0x10] sm:$0xff]  ;;  %v144_v5 = vld [vmem:[%s1169_s3 + $0x8] sm:$0xff] }
   0x3   :  { %906 = vmatprep.mubr.msk.f32.mxu0 %vm57_vm1, %v47_v1  ;;  %905 = vmatpush3.msk.msra.mxu0 %vm64_vm0, %v49_v0  ;;  %v143_v6 = vld [vmem:[%s1169_s3] sm:$0xff]  ;;  %v572_v31 = vld [vmem:[%s1173_s6 + $0x18] sm:$0xff]  ;;  %v571_v32 = vld [vmem:[%s1173_s6 + $0x10] sm:$0xff] }
   0x4   :  { %907 = vmatmul.mubr.msk.f32.vlgmr.msra.gmra.mxu0 %vm57_vm1, %v48_v2  ;;  %910 = vmatpush3.msra.mxu1 %v146_v3  ;;  %v852_v8 = vld [vmem:[%s1170_s2] ss:$0 sm:$0xff]  ;;  %s990_s2 = smov 96   ;;  %v570_v33 = vld [vmem:[%s1173_s6 + $0x8] sm:$0xff] }
   0x5   :  { %911 = vmatprep.subr.mxu1 %v145_v4  ;;  %v856_v13 = vld [vmem:[%s1171_s4] ss:$0 sm:$0xff]  ;;  %920 = vmatprep.subr.mxu0 %v989_v16 }
   0x6   :  { %912 = vmatpush3.msra.mxu1 %v145_v4  ;;  %922 = vmatprep.mubr.msk.f32.mxu0 %vm991_vm3, %v989_v16  ;;  %v240_v26 = vld [vmem:[%s1172_s5] sm:$0xff] }
   0x7   :  { %913 = vmatprep.subr.mxu1 %v144_v5  ;;  %v569_v34 = vld [vmem:[%s1173_s6] sm:$0xff] }
   0x8   :  { %914 = vmatpush3.msra.mxu1 %v144_v5  ;;  %v865_v57 = vld [vmem:[%s1174_s7] ss:$0 sm:$0xff] }
   0x9   :  { %915 = vmatprep.subr.mxu1 %v143_v6 }
   0xa   :  { %916 = vmatpush3.msra.mxu1 %v143_v6 }
   0xb   :  { %930 = vmatprep.subr.mxu1 %v989_v16 }
  0xc4   :  { %v908_v7 = vpop.f32.mrf.mxu0 }
  0xc5   :  { %v140_v11 = vadd.f32 %v908_v7, %v852_v8 }
  0xc6   :  { %v134_v9 = vpop.f32.mrf.mxu0 }
  0xc7   :  { %v135_v10 = vadd.f32 %v852_v8, %v134_v9 }
  0xc9   :  { %917 = vmatprep.mubr.msk.f32.mxu1 %vm154_vm2, %v135_v10 }
  0xca   :  { %918 = vmatmul.mubr.msk.f32.vlgmr.msra.gmra.mxu1 %vm154_vm2, %v140_v11 }
  0xcb   :  { %932 = vmatprep.mubr.msk.f32.mxu1 %vm991_vm3, %v989_v16 }
 0x18a   :  { %v919_v12 = vpop.f32.mrf.mxu1 }
 0x18b   :  { %v233_v18 = vadd.f32 %v919_v12, %v856_v13 }
 0x18c   :  { %v227_v14 = vpop.f32.mrf.mxu1 }
 0x18d   :  { %v228_v15 = vadd.f32 %v856_v13, %v227_v14  ;;  %v238_v20 = vmul.f32 1.442695, %v233_v18  ;;  %v864_v40 = vmul.f32 -1.442695, %v233_v18 }
 0x18f   :  { %v236_v17 = vmul.f32 1.442695, %v228_v15  ;;  %243 = vrot.lane.b32.xlu0 %v228_v15, %s990_s2  ;;  %v863_v37 = vmul.f32 -1.442695, %v228_v15 }
 0x191   :  { %965 = vpow2.f32 %v236_v17  ;;  %v868_v17 = vld [vmem:[%s1175_s8] ss:$0 sm:$0xff] }
 0x192   :  { %967 = vpow2.f32 %v238_v20 }
 0x193   :  { %245 = vrot.lane.b32.xlu0 %v233_v18, %s990_s2  ;;  %969 = vpow2.f32 %v863_v37 }
 0x19e   :  { %v966_v19 = vpop.eup %965 }
 0x19f   :  { %404 = vrot.lane.b32.xlu0 %v966_v19, %s990_s2  ;;  %v968_v23 = vpop.eup %967 }
 0x1a0   :  { %v970_v38 = vpop.eup %969 }
 0x1a1   :  { %v557_v39 = vadd.f32 1.0, %v970_v38 }
 0x201   :  { %v244_v21 = vpop.permute.xlu0 %243 }
 0x202   :  { %v249_v22 = vmul.f32 %v966_v19, %v244_v21  ;;  %v869_v19 = vld [vmem:[%s1176_s9] ss:$0 sm:$0xff] }
 0x204   :  { %252 = vrot.lane.b32.xlu1 %v249_v22, %s990_s2 }
 0x205   :  { %v246_v24 = vpop.permute.xlu0 %245 }
 0x206   :  { %v250_v25 = vmul.f32 %v968_v23, %v246_v24 }
 0x208   :  { %330 = vrot.lane.b32.xlu1 %v250_v25, %s990_s2 }
 0x20c   :  { %478 = vrot.lane.b32.xlu1 %v968_v23, %s990_s2 }
 0x211   :  { %v405_v27 = vpop.permute.xlu0 %404 }
 0x212   :  { %931 = vmatpush3.msra.mxu1 %v405_v27 }
 0x213   :  { %933 = vmatmul.mubr.msk.f32.vlgmr.msra.gmra.mxu1 %vm255_vm4, %v240_v26  ;;  %940 = vmatprep.subr.mxu1 %v572_v31 }
 0x214   :  { %941 = vmatpush3.msra.mxu1 %v572_v31 }
 0x215   :  { %942 = vmatprep.subr.mxu1 %v571_v32 }
 0x216   :  { %943 = vmatpush3.msra.mxu1 %v571_v32 }
 0x217   :  { %944 = vmatprep.subr.mxu1 %v570_v33 }
 0x218   :  { %945 = vmatpush3.msra.mxu1 %v570_v33 }
 0x219   :  { %946 = vmatprep.subr.mxu1 %v569_v34 }
 0x21a   :  { %947 = vmatpush3.msra.mxu1 %v569_v34 }
 0x276   :  { %v253_v28 = vpop.permute.xlu1 %252 }
 0x277   :  { %921 = vmatpush3.msra.mxu0 %v253_v28 }
 0x278   :  { %923 = vmatmul.mubr.msk.f32.vlgmr.msra.gmra.mxu0 %vm255_vm4, %v240_v26  ;;  %925 = vmatprep.subr.mxu0 %v989_v16 }
 0x279   :  { %927 = vmatprep.mubr.msk.f32.mxu0 %vm991_vm3, %v989_v16 }
 0x27a   :  { %v331_v29 = vpop.permute.xlu1 %330 }
 0x27b   :  { %926 = vmatpush3.msra.mxu0 %v331_v29 }
 0x27c   :  { %928 = vmatmul.mubr.msk.f32.vlgmr.msra.gmra.mxu0 %vm255_vm4, %v240_v26  ;;  %935 = vmatprep.subr.mxu0 %v989_v16 }
 0x27d   :  { %937 = vmatprep.mubr.msk.f32.mxu0 %vm991_vm3, %v989_v16 }
 0x27e   :  { %v479_v30 = vpop.permute.xlu1 %478 }
 0x27f   :  { %936 = vmatpush3.msra.mxu0 %v479_v30 }
 0x280   :  { %938 = vmatmul.mubr.msk.f32.vlgmr.msra.gmra.mxu0 %vm255_vm4, %v240_v26 }
 0x2d3   :  { %v473_v35 = vpop.f32.mrf.mxu1 }
 0x2d4   :  { %971 = vrcp.f32 %v473_v35 }
 0x2d5   :  { %v934_v36 = vpop.f32.mrf.mxu1  ;;  %973 = vrcp.f32 %v557_v39 }
 0x2d6   :  { %975 = vpow2.f32 %v864_v40 }
 0x2e1   :  { %v972_v41 = vpop.eup %971 }
 0x2e2   :  { %v974_v44 = vpop.eup %973 }
 0x2e3   :  { %v976_v47 = vpop.eup %975 }
 0x2e4   :  { %v558_v50 = vadd.f32 1.0, %v976_v47 }
 0x338   :  { %v325_v42 = vpop.f32.mrf.mxu0 }
 0x339   :  { %v564_v43 = vmul.f32 %v972_v41, %v325_v42  ;;  %v757_v42 = vld [vmem:[%s1177_s12 + $0x18] sm:$0xff] }
 0x33a   :  { %v924_v45 = vpop.f32.mrf.mxu0  ;;  %951 = vmatprep.subr.mxu0 %v757_v42 }
 0x33b   :  { %v567_v46 = vmul.f32 %v974_v44, %v564_v43  ;;  %v756_v43 = vld [vmem:[%s1177_s12 + $0x10] sm:$0xff]  ;;  %952 = vmatpush3.msra.mxu0 %v757_v42  ;;  %v755_v44 = vld [vmem:[%s1177_s12 + $0x8] sm:$0xff]  ;;  %v754_v45 = vld [vmem:[%s1177_s12] sm:$0xff] }
 0x33c   :  { %v399_v48 = vpop.f32.mrf.mxu0  ;;  %953 = vmatprep.subr.mxu0 %v756_v43 }
 0x33d   :  { %948 = vmatprep.mubr.msk.f32.mxu1 %vm154_vm2, %v567_v46  ;;  %954 = vmatpush3.msra.mxu0 %v756_v43 }
 0x33e   :  { %v929_v49 = vpop.f32.mrf.mxu0  ;;  %955 = vmatprep.subr.mxu0 %v755_v44 }
 0x33f   :  { %956 = vmatpush3.msra.mxu0 %v755_v44 }
 0x340   :  { %v547_v51 = vpop.f32.mrf.mxu0  ;;  %957 = vmatprep.subr.mxu0 %v754_v45 }
 0x341   :  { %977 = vrcp.f32 %v547_v51  ;;  %958 = vmatpush3.msra.mxu0 %v754_v45 }
 0x342   :  { %v939_v52 = vpop.f32.mrf.mxu0  ;;  %979 = vrcp.f32 %v558_v50 }
 0x34e   :  { %v978_v53 = vpop.eup %977 }
 0x34f   :  { %v566_v54 = vmul.f32 %v978_v53, %v399_v48  ;;  %v980_v55 = vpop.eup %979  ;;  %v870_v53 = vld [vmem:[%s1178_s10] ss:$0 sm:$0xff] }
 0x351   :  { %v568_v56 = vmul.f32 %v980_v55, %v566_v54  ;;  %v871_v55 = vld [vmem:[%s1179_s11] ss:$0 sm:$0xff] }
 0x353   :  { %949 = vmatmul.mubr.msk.f32.vlgmr.msra.gmra.mxu1 %vm154_vm2, %v568_v56 }
 0x413   :  { %v950_v58 = vpop.f32.mrf.mxu1 }
 0x414   :  { %v658_v59 = vadd.f32 %v950_v58, %v865_v57 }
 0x415   :  { %v652_v60 = vpop.f32.mrf.mxu1 }
 0x416   :  { %v653_v61 = vadd.f32 %v865_v57, %v652_v60  ;;  %v668_v62 = vsel %vm154_vm2, %v658_v59, 0.0  ;;  %v662_v28 = vmax.f32 %v658_v59, 0.0 }
 0x417   :  { %669 = vadd.xlane.f32.xlu1 %v668_v62  ;;  %v872_v62 = vld [vmem:[%s1180_s13] ss:$0 sm:$0xff] }
 0x418   :  { %v665_v63 = vsel %vm154_vm2, %v653_v61, 0.0  ;;  %v661_v22 = vmax.f32 %v653_v61, 0.0 }
 0x419   :  { %666 = vadd.xlane.f32.xlu0 %v665_v63 }
 0x4a0   :  { %v670_v0 = vpop.xlane.xlu1 %669 }
 0x4a1   :  { %v673_v1 = vmul.f32 0.03125, %v670_v0 }
 0x4a2   :  { %v667_v2 = vpop.xlane.xlu0 %666 }
 0x4a3   :  { %v672_v3 = vmul.f32 0.03125, %v667_v2  ;;  %v675_v4 = vsub.f32 %v658_v59, %v673_v1 }
 0x4a5   :  { %v674_v5 = vsub.f32 %v653_v61, %v672_v3  ;;  %v677_v8 = vmul.f32 %v675_v4, %v675_v4 }
 0x4a7   :  { %v676_v6 = vmul.f32 %v674_v5, %v674_v5  ;;  %v681_v9 = vsel %vm154_vm2, %v677_v8, 0.0 }
 0x4a9   :  { %v678_v7 = vsel %vm154_vm2, %v676_v6, 0.0 }
 0x4aa   :  { %679 = vadd.xlane.f32.xlu0 %v678_v7 }
 0x4ae   :  { %682 = vadd.xlane.f32.xlu0 %v681_v9 }
 0x533   :  { %v680_v10 = vpop.xlane.xlu0 %679 }
 0x534   :  { %v684_v11 = vmul.f32 0.03125, %v680_v10 }
 0x536   :  { %v686_v12 = vadd.f32 1e-05, %v684_v11 }
 0x537   :  { %v683_v13 = vpop.xlane.xlu0 %682 }
 0x538   :  { %981 = vrsqrt.f32 %v686_v12  ;;  %v685_v14 = vmul.f32 0.03125, %v683_v13 }
 0x53a   :  { %v687_v15 = vadd.f32 1e-05, %v685_v14 }
 0x53c   :  { %983 = vrsqrt.f32 %v687_v15 }
 0x545   :  { %v982_v16 = vpop.eup %981 }
 0x546   :  { %v690_v18 = vmul.f32 %v982_v16, %v674_v5 }
 0x548   :  { %v698_v20 = vmul.f32 %v868_v17, %v690_v18 }
 0x549   :  { %v984_v21 = vpop.eup %983 }
 0x54a   :  { %v706_v23 = vadd.f32 %v869_v19, %v698_v20  ;;  %v691_v24 = vmul.f32 %v984_v21, %v675_v4 }
 0x54c   :  { %v708_v25 = vmul.f32 %v706_v23, %v661_v22  ;;  %v699_v26 = vmul.f32 %v868_v17, %v691_v24 }
 0x54e   :  { %v712_v27 = vsel %vm154_vm2, %v708_v25, 0.0  ;;  %v707_v29 = vadd.f32 %v869_v19, %v699_v26 }
 0x54f   :  { %713 = vadd.xlane.f32.xlu1 %v712_v27 }
 0x550   :  { %v709_v30 = vmul.f32 %v707_v29, %v662_v28 }
 0x552   :  { %v715_v31 = vsel %vm154_vm2, %v709_v30, 0.0 }
 0x553   :  { %716 = vadd.xlane.f32.xlu0 %v715_v31 }
 0x5d8   :  { %v714_v32 = vpop.xlane.xlu1 %713 }
 0x5d9   :  { %v718_v33 = vmul.f32 0.03125, %v714_v32 }
 0x5db   :  { %v720_v34 = vsub.f32 %v708_v25, %v718_v33 }
 0x5dc   :  { %v717_v35 = vpop.xlane.xlu0 %716 }
 0x5dd   :  { %v719_v36 = vmul.f32 0.03125, %v717_v35  ;;  %v722_v37 = vmul.f32 %v720_v34, %v720_v34 }
 0x5df   :  { %v721_v38 = vsub.f32 %v709_v30, %v719_v36  ;;  %v724_v39 = vsel %vm154_vm2, %v722_v37, 0.0 }
 0x5e0   :  { %725 = vadd.xlane.f32.xlu1 %v724_v39 }
 0x5e1   :  { %v723_v40 = vmul.f32 %v721_v38, %v721_v38 }
 0x5e3   :  { %v727_v41 = vsel %vm154_vm2, %v723_v40, 0.0 }
 0x5e4   :  { %728 = vadd.xlane.f32.xlu0 %v727_v41 }
 0x669   :  { %v726_v46 = vpop.xlane.xlu1 %725 }
 0x66a   :  { %v730_v47 = vmul.f32 0.03125, %v726_v46 }
 0x66c   :  { %v732_v48 = vadd.f32 1e-05, %v730_v47 }
 0x66d   :  { %v729_v49 = vpop.xlane.xlu0 %728 }
 0x66e   :  { %985 = vrsqrt.f32 %v732_v48  ;;  %v731_v50 = vmul.f32 0.03125, %v729_v49 }
 0x670   :  { %v733_v51 = vadd.f32 1e-05, %v731_v50 }
 0x672   :  { %987 = vrsqrt.f32 %v733_v51 }
 0x67b   :  { %v986_v52 = vpop.eup %985 }
 0x67c   :  { %v736_v54 = vmul.f32 %v986_v52, %v720_v34 }
 0x67e   :  { %v744_v56 = vmul.f32 %v870_v53, %v736_v54 }
 0x67f   :  { %v988_v57 = vpop.eup %987 }
 0x680   :  { %v737_v58 = vmul.f32 %v988_v57, %v721_v38  ;;  %v752_v59 = vadd.f32 %v871_v55, %v744_v56 }
 0x682   :  { %v745_v60 = vmul.f32 %v870_v53, %v737_v58  ;;  %959 = vmatprep.mubr.msk.f32.mxu0 %vm154_vm2, %v752_v59 }
 0x684   :  { %v753_v61 = vadd.f32 %v871_v55, %v745_v60 }
 0x686   :  { %960 = vmatmul.mubr.msk.f32.vlgmr.msra.gmra.mxu0 %vm154_vm2, %v753_v61 }
 0x746   :  { %v961_v63 = vpop.f32.mrf.mxu0 }
 0x747   :  { %v843_v0 = vadd.f32 %v961_v63, %v872_v62 }
 0x748   :  { %v837_v1 = vpop.f32.mrf.mxu0 }
 0x749   :  { %847 = vst [vmem:[%s1181_s14 + $0x8] sm:$0xff] %v843_v0  ;;  %v838_v2 = vadd.f32 %v872_v62, %v837_v1 }
 0x74b   :  { %846 = vst [vmem:[%s1181_s14] sm:$0xff] %v838_v2 }

</bundles_post_ra>
